<compile_context>
chip_gen: v7x
topology: tpu7x:2x2x1
jax: 0.10.0
libtpu: 0.0.40
codegen_flags: <defaults>
</compile_context>

<pallas_src>
import math

import jax
import jax.numpy as jnp
import numpy as np
from jax import lax
from jax.experimental import pallas as pl
from jax.experimental.pallas import tpu as pltpu


def _round_up(v, m):
    return ((v + m - 1) // m) * m


def _vmem_budget_bytes():
    """Per-generation VMEM budget: ~half of physical (64 MiB on v5e/v6e, 32 MiB on v7x)."""
    cap = None
    try:
        cap = getattr(pltpu.get_tpu_info(), "vmem_capacity_bytes", None)
    except Exception:
        cap = None
    if not cap:
        cap = 64 * 1024 * 1024
    return int(min(max(cap // 2, 32 * 1024 * 1024), 100 * 1024 * 1024))


def _vmem_need_bytes(t_chunk, bp, hp, inp):
    """Rough VMEM footprint: hs scratch + double-buffered x/y blocks + weights + h0/hout."""
    f = 4
    hs = t_chunk * bp * hp * f                       # hidden-state scratch (1 buffer)
    x = 2 * t_chunk * bp * inp * f                   # x chunk (double-buffered)
    y = 2 * t_chunk * bp * f                         # y chunk (double-buffered)
    w = 2 * (inp * hp + hp * hp + 2 * hp) * f        # wih, whh, bias, wout
    h = 2 * 2 * bp * hp * f                          # h0 input + hout output
    return hs + x + y + w + h


def _pick_t_chunk(T, bp, hp, inp, budget_bytes):
    """Largest chunk that keeps y lane-dense (t_chunk*Bp % 128 == 0) and fits the budget."""
    base = 128 // math.gcd(bp, 128)
    cap = min(_round_up(max(T, 1), base), 1024)
    tc = base
    while tc + base <= cap and _vmem_need_bytes(tc + base, bp, hp, inp) <= budget_bytes:
        tc += base
    return tc


def _make_kernel(tc, bp, last_real_row, unroll):
    """One time-chunk of a single-layer tanh RNN + Linear(H, 1).

    x_ref:    (tc*Bp, I)        time-major, batch-minor input chunk (pre-flattened)
    h0_ref:   (Bp, Hp)          initial hidden state (padded)
    wih_ref:  (I, Hp)           W_ih^T   (zero-padded in H)
    whh_ref:  (Hp, Hp)          W_hh^T   (zero-padded)
    b_ref:    (1, Hp)           b_ih + b_hh (zero-padded)
    wout_ref: (1, Hp)           Linear weight as a ROW (zero-padded) -> VPU reduce
    bout_ref: (1,)              Linear bias scalar in SMEM
    y_ref:    (1, 1, tc*Bp)     lane-dense per-chunk outputs
    hout_ref: (Bp, Hp)          resident output block == hidden-state carry
    hs_ref:   (tc*Bp, Hp)       VMEM scratch: per-step hidden states of this chunk
    """

    def kernel(x_ref, h0_ref, wih_ref, whh_ref, b_ref, wout_ref, bout_ref,
               y_ref, hout_ref, hs_ref):
        c = pl.program_id(0)
        last_chunk = pl.num_programs(0) - 1

        # hout doubles as the cross-chunk hidden-state carry (resident output block).
        @pl.when(c == 0)
        def _():
            hout_ref[...] = h0_ref[...]

        # Hoist weight/bias loads out of the serial time loop.
        wih = wih_ref[...]
        whh = whh_ref[...]
        bias = b_ref[...]                                        # (1, Hp)

        # (1) Hoisted input projection: ONE MXU matmul for the whole chunk.
        hs_ref[...] = (jnp.dot(x_ref[...], wih, preferred_element_type=jnp.float32)
                       + bias)

        # (2) Serial recurrence: only h @ W_hh + tanh on the critical path.
        def step(t, h):
            row = pl.multiple_of(t * bp, bp)
            h_new = jnp.tanh(hs_ref[pl.ds(row, bp), :]
                             + jnp.dot(h, whh, preferred_element_type=jnp.float32))
            hs_ref[pl.ds(row, bp), :] = h_new
            return h_new

        h_final = lax.fori_loop(0, tc, step, hout_ref[...], unroll=unroll)

        # Carry the hidden state to the next chunk. Time padding (zeros) only sits at
        # the tail of the LAST chunk, so on that chunk the true final hidden state is
        # the one stored at the last REAL timestep, not the end-of-chunk value.
        @pl.when(c != last_chunk)
        def _():
            hout_ref[...] = h_final

        @pl.when(c == last_chunk)
        def _():
            hout_ref[...] = hs_ref[pl.ds(last_real_row, bp), :]

        # (3) Output Linear(H -> 1): VPU multiply + lane reduce for all timesteps of
        # the chunk, written to the lane-dense y slab (no N=1 MXU matmul, no 1-lane
        # masked stores). XLU/VPU slots are idle next to the serial recurrence.
        y = jnp.sum(hs_ref[...] * wout_ref[...], axis=-1) + bout_ref[0]   # (tc*Bp,)
        y_ref[...] = y.reshape(1, 1, tc * bp)

    return kernel


def rnn_forward(x_btI, h_state, params, *, t_chunk=None):
    """x_btI: (B, T, I) batch-first; h_state: (1, B, H). Returns (y (B,T,1), h (1,B,H))."""
    wih, whh, b_ih, b_hh, wout, bout = params
    B, T, I = x_btI.shape
    H = whh.shape[0]

    Bp = _round_up(max(B, 1), 8)          # sublane multiple
    Hp = _round_up(max(H, 1), 128)        # lane multiple

    budget = _vmem_budget_bytes()
    base = 128 // math.gcd(Bp, 128)       # keeps t_chunk*Bp a multiple of 128
    if t_chunk is None:
        t_chunk = _pick_t_chunk(T, Bp, Hp, I, budget)
    else:
        t_chunk = _round_up(max(int(t_chunk), 1), base)
    num_chunks = -(-T // t_chunk)
    Tp = num_chunks * t_chunk
    last_real_row = ((T - 1) % t_chunk) * Bp          # row of the last REAL step's h
    unroll = True if t_chunk <= 16 else 8             # cap unroll to avoid vreg spills
    vmem_limit = int(max(budget, _vmem_need_bytes(t_chunk, Bp, Hp, I) + (4 << 20)))

    f32 = jnp.float32
    # Zero padding keeps the recurrence exact: padded hidden columns provably stay 0,
    # padded batch rows / padded tail timesteps never mix with real ones and are
    # sliced off below (do NOT reuse the padded rows of hout).
    x_tbI = jnp.transpose(x_btI, (1, 0, 2)).astype(f32)                   # (T, B, I)
    x_p = jnp.pad(x_tbI, ((0, Tp - T), (0, Bp - B), (0, 0)))              # (Tp, Bp, I)
    x_flat = x_p.reshape(Tp * Bp, I)                                      # pre-flattened
    h0_p = jnp.pad(h_state[0].astype(f32), ((0, Bp - B), (0, Hp - H)))    # (Bp, Hp)
    wih_p = jnp.pad(wih.T.astype(f32), ((0, 0), (0, Hp - H)))             # (I, Hp)
    whh_p = jnp.pad(whh.T.astype(f32), ((0, Hp - H), (0, Hp - H)))        # (Hp, Hp)
    b_p = jnp.pad((b_ih + b_hh).astype(f32), (0, Hp - H))[None, :]        # (1, Hp)
    wout_p = jnp.pad(wout.astype(f32).reshape(-1), (0, Hp - H))[None, :]  # (1, Hp) row
    bout_p = bout.astype(f32).reshape(1)                                  # (1,) SMEM

    grid_spec = pltpu.PrefetchScalarGridSpec(
        num_scalar_prefetch=0,
        grid=(num_chunks,),
        in_specs=[
            pl.BlockSpec((t_chunk * Bp, I), lambda c: (c, 0)),     # x chunks (pipelined)
            pl.BlockSpec((Bp, Hp), lambda c: (0, 0)),              # h0
            pl.BlockSpec((I, Hp), lambda c: (0, 0)),               # W_ih^T
            pl.BlockSpec((Hp, Hp), lambda c: (0, 0)),              # W_hh^T
            pl.BlockSpec((1, Hp), lambda c: (0, 0)),               # bias row
            pl.BlockSpec((1, Hp), lambda c: (0, 0)),               # W_out row
            pl.BlockSpec(memory_space=pltpu.MemorySpace.SMEM),     # b_out scalar
        ],
        out_specs=(
            pl.BlockSpec((1, 1, t_chunk * Bp), lambda c: (c, 0, 0)),  # lane-dense y
            pl.BlockSpec((Bp, Hp), lambda c: (0, 0)),                 # final h (resident carry)
        ),
        scratch_shapes=[
            pltpu.VMEM((t_chunk * Bp, Hp), jnp.float32),           # per-chunk hidden states
        ],
    )

    y_slab, h_final = pl.pallas_call(
        _make_kernel(t_chunk, Bp, last_real_row, unroll),
        out_shape=(
            jax.ShapeDtypeStruct((num_chunks, 1, t_chunk * Bp), jnp.float32),
            jax.ShapeDtypeStruct((Bp, Hp), jnp.float32),
        ),
        grid_spec=grid_spec,
        compiler_params=pltpu.CompilerParams(
            dimension_semantics=("arbitrary",),          # time recurrence is sequential
            vmem_limit_bytes=vmem_limit,
        ),
    )(x_flat, h0_p, wih_p, whh_p, b_p, wout_p, bout_p)

    # Back to PyTorch conventions; strip batch/time padding.
    y_tb = y_slab.reshape(Tp, Bp)[:T, :B]                       # (T, B)
    y_bt1 = jnp.transpose(y_tb, (1, 0))[..., None]              # (B, T, 1)
    return y_bt1, h_final[:B, :H][None, :, :]                   # (1, B, H)


def rnn_reference(x_btI, h_state, params):
    """Pure-JAX reference matching torch.nn.RNN(tanh, batch_first) + Linear."""
    wih, whh, b_ih, b_hh, wout, bout = params
    h0 = h_state[0]

    def cell(h, xt):
        h_new = jnp.tanh(xt @ wih.T + b_ih + h @ whh.T + b_hh)
        y = h_new @ wout.T + bout
        return h_new, y

    x_tbI = jnp.transpose(x_btI, (1, 0, 2))
    h_final, y_tb1 = lax.scan(cell, h0, x_tbI)
    return jnp.transpose(y_tb1, (1, 0, 2)), h_final[None, :, :]


if __name__ == "__main__":
    B, T, I, H = 2, 8, 8, 32  # batch, seq, input_size, hidden_size
    key = jax.random.PRNGKey(0)
    kx, kh, k1, k2, k3, k4, k5, k6, kx2, kh2 = jax.random.split(key, 10)

    bound = 1.0 / np.sqrt(H)
    # Deterministic synthetic parameters (same shapes as nn.RNN / nn.Linear).
    wih = jax.random.uniform(k1, (H, I), jnp.float32, -bound, bound)   # weight_ih_l0
    whh = jax.random.uniform(k2, (H, H), jnp.float32, -bound, bound)   # weight_hh_l0
    b_ih = jax.random.uniform(k3, (H,), jnp.float32, -bound, bound)
    b_hh = jax.random.uniform(k4, (H,), jnp.float32, -bound, bound)
    wout = jax.random.uniform(k5, (1, H), jnp.float32, -bound, bound)  # Linear weight
    bout = jax.random.uniform(k6, (1,), jnp.float32, -bound, bound)    # Linear bias
    params = (wih, whh, b_ih, b_hh, wout, bout)

    # Small config from the spec (single chunk, padded time tail).
    x = jax.random.normal(kx, (B, T, I), jnp.float32)
    h_state = jax.random.normal(kh, (1, B, H), jnp.float32)
    y, h_final = rnn_forward(x, h_state, params)
    y = jax.block_until_ready(y)
    h_final = jax.block_until_ready(h_final)
    y_ref, h_ref = rnn_reference(x, h_state, params)
    assert y.shape == (B, T, 1) and h_final.shape == (1, B, H)
    np.testing.assert_allclose(np.asarray(y), np.asarray(y_ref), atol=1e-5, rtol=1e-5)
    np.testing.assert_allclose(np.asarray(h_final), np.asarray(h_ref), atol=1e-5, rtol=1e-5)

    # Multi-chunk config: exercises the resident-hout hidden carry across 3 grid steps
    # plus a zero-padded tail in the last chunk (T=40, t_chunk=16 -> Tp=48).
    T2 = 40
    x2 = jax.random.normal(kx2, (B, T2, I), jnp.float32)
    h2 = jax.random.normal(kh2, (1, B, H), jnp.float32)
    y2, h2_final = rnn_forward(x2, h2, params, t_chunk=16)
    y2 = jax.block_until_ready(y2)
    h2_final = jax.block_until_ready(h2_final)
    y2_ref, h2_ref = rnn_reference(x2, h2, params)
    assert y2.shape == (B, T2, 1) and h2_final.shape == (1, B, H)
    np.testing.assert_allclose(np.asarray(y2), np.asarray(y2_ref), atol=1e-4, rtol=1e-4)
    np.testing.assert_allclose(np.asarray(h2_final), np.asarray(h2_ref), atol=1e-4, rtol=1e-4)

    print("KERNEL_OK")
</pallas_src>

<mosaic_0001>
module attributes {stable_mosaic.version = 11 : i64} {
  func.func @kernel(%arg0: i32, %arg1: memref<128x8xf32, #tpu.memory_space<vmem>>, %arg2: memref<8x128xf32, #tpu.memory_space<vmem>>, %arg3: memref<8x128xf32, #tpu.memory_space<vmem>>, %arg4: memref<128x128xf32, #tpu.memory_space<vmem>>, %arg5: memref<1x128xf32, #tpu.memory_space<vmem>>, %arg6: memref<1x128xf32, #tpu.memory_space<vmem>>, %arg7: memref<1xf32, #tpu.memory_space<smem>>, %arg8: memref<1x1x128xf32, #tpu.memory_space<vmem>>, %arg9: memref<8x128xf32, #tpu.memory_space<vmem>>, %arg10: memref<128x128xf32, #tpu.memory_space<vmem>>) attributes {dimension_semantics = [#tpu.dimension_semantics<arbitrary>], iteration_bounds = array<i64: 1>, scalar_prefetch = 0 : i64, scratch_operands = 1 : i64, tpu.core_type = #tpu.core_type<tc>, window_params = [{transform_indices = @transform_0, window_bounds = array<i64: 128, 8>}, {pipeline_mode = #tpu.pipeline_mode<synchronous>, transform_indices = @transform_1, window_bounds = array<i64: 8, 128>}, {pipeline_mode = #tpu.pipeline_mode<synchronous>, transform_indices = @transform_2, window_bounds = array<i64: 8, 128>}, {pipeline_mode = #tpu.pipeline_mode<synchronous>, transform_indices = @transform_3, window_bounds = array<i64: 128, 128>}, {pipeline_mode = #tpu.pipeline_mode<synchronous>, transform_indices = @transform_4, window_bounds = array<i64: 1, 128>}, {pipeline_mode = #tpu.pipeline_mode<synchronous>, transform_indices = @transform_5, window_bounds = array<i64: 1, 128>}, {transform_indices = @transform_6, window_bounds = array<i64: 1>}, {transform_indices = @transform_7, window_bounds = array<i64: 1, 1, 128>}, {pipeline_mode = #tpu.pipeline_mode<synchronous>, transform_indices = @transform_8, window_bounds = array<i64: 8, 128>}]} {
    %c0_i32 = arith.constant 0 : i32
    %0 = arith.cmpi eq, %arg0, %c0_i32 : i32
    %1 = arith.extui %0 : i1 to i32
    %c0_i32_0 = arith.constant 0 : i32
    %2 = arith.cmpi ne, %1, %c0_i32_0 : i32
    scf.if %2 {
      %c0_90 = arith.constant 0 : index
      %c0_91 = arith.constant 0 : index
      %172 = vector.load %arg2[%c0_90, %c0_91] : memref<8x128xf32, #tpu.memory_space<vmem>>, vector<8x128xf32>
      %c0_92 = arith.constant 0 : index
      %c0_93 = arith.constant 0 : index
      %173 = vector.load %arg9[%c0_92, %c0_93] : memref<8x128xf32, #tpu.memory_space<vmem>>, vector<8x128xf32>
      tpu.vector_store %arg9[%c0_92, %c0_93], %172 {strides = array<i32>} : memref<8x128xf32, #tpu.memory_space<vmem>>, vector<8x128xf32>,
    } else {
    }
    %c0 = arith.constant 0 : index
    %c0_1 = arith.constant 0 : index
    %3 = vector.load %arg3[%c0, %c0_1] : memref<8x128xf32, #tpu.memory_space<vmem>>, vector<8x128xf32>
    %c0_2 = arith.constant 0 : index
    %c0_3 = arith.constant 0 : index
    %4 = vector.load %arg4[%c0_2, %c0_3] : memref<128x128xf32, #tpu.memory_space<vmem>>, vector<128x128xf32>
    %c0_4 = arith.constant 0 : index
    %c0_5 = arith.constant 0 : index
    %5 = vector.load %arg5[%c0_4, %c0_5] : memref<1x128xf32, #tpu.memory_space<vmem>>, vector<1x128xf32>
    %c0_6 = arith.constant 0 : index
    %c0_7 = arith.constant 0 : index
    %6 = vector.load %arg1[%c0_6, %c0_7] : memref<128x8xf32, #tpu.memory_space<vmem>>, vector<128x8xf32>
    %cst = arith.constant dense<0.000000e+00> : vector<128x128xf32>
    %7 = tpu.matmul %6, %3, %cst {dimension_numbers = #tpu.dot_dimension_numbers<[1], [0], [0], [1], [0, 0, 1, 1], [], []>} : vector<128x8xf32>, vector<8x128xf32>, vector<128x128xf32> -> vector<128x128xf32>
    %8 = vector.broadcast %5 : vector<1x128xf32> to vector<128x128xf32>
    %9 = arith.addf %7, %8 : vector<128x128xf32>
    %c0_8 = arith.constant 0 : index
    %c0_9 = arith.constant 0 : index
    %10 = vector.load %arg10[%c0_8, %c0_9] : memref<128x128xf32, #tpu.memory_space<vmem>>, vector<128x128xf32>
    tpu.vector_store %arg10[%c0_8, %c0_9], %9 {strides = array<i32>} : memref<128x128xf32, #tpu.memory_space<vmem>>, vector<128x128xf32>,
    %c0_10 = arith.constant 0 : index
    %c0_11 = arith.constant 0 : index
    %11 = vector.load %arg9[%c0_10, %c0_11] : memref<8x128xf32, #tpu.memory_space<vmem>>, vector<8x128xf32>
    %c0_i32_12 = arith.constant 0 : i32
    %c8_i32 = arith.constant 8 : i32
    %12 = arith.muli %c0_i32_12, %c8_i32 : i32
    %13 = tpu.assume_multiple %12, 8 : i32
    %14 = arith.index_cast %13 : i32 to index
    %c0_13 = arith.constant 0 : index
    %15 = vector.load %arg10[%14, %c0_13] : memref<128x128xf32, #tpu.memory_space<vmem>>, vector<8x128xf32>
    %cst_14 = arith.constant dense<0.000000e+00> : vector<8x128xf32>
    %16 = tpu.matmul %11, %4, %cst_14 {dimension_numbers = #tpu.dot_dimension_numbers<[1], [0], [0], [1], [0, 0, 1, 1], [], []>} : vector<8x128xf32>, vector<128x128xf32>, vector<8x128xf32> -> vector<8x128xf32>
    %17 = arith.addf %15, %16 : vector<8x128xf32>
    %18 = math.tanh %17 : vector<8x128xf32>
    %19 = arith.index_cast %13 : i32 to index
    %c0_15 = arith.constant 0 : index
    %20 = vector.load %arg10[%19, %c0_15] : memref<128x128xf32, #tpu.memory_space<vmem>>, vector<8x128xf32>
    tpu.vector_store %arg10[%19, %c0_15], %18 {strides = array<i32>} : memref<128x128xf32, #tpu.memory_space<vmem>>, vector<8x128xf32>,
    %c1_i32 = arith.constant 1 : i32
    %c8_i32_16 = arith.constant 8 : i32
    %21 = arith.muli %c1_i32, %c8_i32_16 : i32
    %22 = tpu.assume_multiple %21, 8 : i32
    %23 = arith.index_cast %22 : i32 to index
    %c0_17 = arith.constant 0 : index
    %24 = vector.load %arg10[%23, %c0_17] : memref<128x128xf32, #tpu.memory_space<vmem>>, vector<8x128xf32>
    %cst_18 = arith.constant dense<0.000000e+00> : vector<8x128xf32>
    %25 = tpu.matmul %18, %4, %cst_18 {dimension_numbers = #tpu.dot_dimension_numbers<[1], [0], [0], [1], [0, 0, 1, 1], [], []>} : vector<8x128xf32>, vector<128x128xf32>, vector<8x128xf32> -> vector<8x128xf32>
    %26 = arith.addf %24, %25 : vector<8x128xf32>
    %27 = math.tanh %26 : vector<8x128xf32>
    %28 = arith.index_cast %22 : i32 to index
    %c0_19 = arith.constant 0 : index
    %29 = vector.load %arg10[%28, %c0_19] : memref<128x128xf32, #tpu.memory_space<vmem>>, vector<8x128xf32>
    tpu.vector_store %arg10[%28, %c0_19], %27 {strides = array<i32>} : memref<128x128xf32, #tpu.memory_space<vmem>>, vector<8x128xf32>,
    %c2_i32 = arith.constant 2 : i32
    %c8_i32_20 = arith.constant 8 : i32
    %30 = arith.muli %c2_i32, %c8_i32_20 : i32
    %31 = tpu.assume_multiple %30, 8 : i32
    %32 = arith.index_cast %31 : i32 to index
    %c0_21 = arith.constant 0 : index
    %33 = vector.load %arg10[%32, %c0_21] : memref<128x128xf32, #tpu.memory_space<vmem>>, vector<8x128xf32>
    %cst_22 = arith.constant dense<0.000000e+00> : vector<8x128xf32>
    %34 = tpu.matmul %27, %4, %cst_22 {dimension_numbers = #tpu.dot_dimension_numbers<[1], [0], [0], [1], [0, 0, 1, 1], [], []>} : vector<8x128xf32>, vector<128x128xf32>, vector<8x128xf32> -> vector<8x128xf32>
    %35 = arith.addf %33, %34 : vector<8x128xf32>
    %36 = math.tanh %35 : vector<8x128xf32>
    %37 = arith.index_cast %31 : i32 to index
    %c0_23 = arith.constant 0 : index
    %38 = vector.load %arg10[%37, %c0_23] : memref<128x128xf32, #tpu.memory_space<vmem>>, vector<8x128xf32>
    tpu.vector_store %arg10[%37, %c0_23], %36 {strides = array<i32>} : memref<128x128xf32, #tpu.memory_space<vmem>>, vector<8x128xf32>,
    %c3_i32 = arith.constant 3 : i32
    %c8_i32_24 = arith.constant 8 : i32
    %39 = arith.muli %c3_i32, %c8_i32_24 : i32
    %40 = tpu.assume_multiple %39, 8 : i32
    %41 = arith.index_cast %40 : i32 to index
    %c0_25 = arith.constant 0 : index
    %42 = vector.load %arg10[%41, %c0_25] : memref<128x128xf32, #tpu.memory_space<vmem>>, vector<8x128xf32>
    %cst_26 = arith.constant dense<0.000000e+00> : vector<8x128xf32>
    %43 = tpu.matmul %36, %4, %cst_26 {dimension_numbers = #tpu.dot_dimension_numbers<[1], [0], [0], [1], [0, 0, 1, 1], [], []>} : vector<8x128xf32>, vector<128x128xf32>, vector<8x128xf32> -> vector<8x128xf32>
    %44 = arith.addf %42, %43 : vector<8x128xf32>
    %45 = math.tanh %44 : vector<8x128xf32>
    %46 = arith.index_cast %40 : i32 to index
    %c0_27 = arith.constant 0 : index
    %47 = vector.load %arg10[%46, %c0_27] : memref<128x128xf32, #tpu.memory_space<vmem>>, vector<8x128xf32>
    tpu.vector_store %arg10[%46, %c0_27], %45 {strides = array<i32>} : memref<128x128xf32, #tpu.memory_space<vmem>>, vector<8x128xf32>,
    %c4_i32 = arith.constant 4 : i32
    %c8_i32_28 = arith.constant 8 : i32
    %48 = arith.muli %c4_i32, %c8_i32_28 : i32
    %49 = tpu.assume_multiple %48, 8 : i32
    %50 = arith.index_cast %49 : i32 to index
    %c0_29 = arith.constant 0 : index
    %51 = vector.load %arg10[%50, %c0_29] : memref<128x128xf32, #tpu.memory_space<vmem>>, vector<8x128xf32>
    %cst_30 = arith.constant dense<0.000000e+00> : vector<8x128xf32>
    %52 = tpu.matmul %45, %4, %cst_30 {dimension_numbers = #tpu.dot_dimension_numbers<[1], [0], [0], [1], [0, 0, 1, 1], [], []>} : vector<8x128xf32>, vector<128x128xf32>, vector<8x128xf32> -> vector<8x128xf32>
    %53 = arith.addf %51, %52 : vector<8x128xf32>
    %54 = math.tanh %53 : vector<8x128xf32>
    %55 = arith.index_cast %49 : i32 to index
    %c0_31 = arith.constant 0 : index
    %56 = vector.load %arg10[%55, %c0_31] : memref<128x128xf32, #tpu.memory_space<vmem>>, vector<8x128xf32>
    tpu.vector_store %arg10[%55, %c0_31], %54 {strides = array<i32>} : memref<128x128xf32, #tpu.memory_space<vmem>>, vector<8x128xf32>,
    %c5_i32 = arith.constant 5 : i32
    %c8_i32_32 = arith.constant 8 : i32
    %57 = arith.muli %c5_i32, %c8_i32_32 : i32
    %58 = tpu.assume_multiple %57, 8 : i32
    %59 = arith.index_cast %58 : i32 to index
    %c0_33 = arith.constant 0 : index
    %60 = vector.load %arg10[%59, %c0_33] : memref<128x128xf32, #tpu.memory_space<vmem>>, vector<8x128xf32>
    %cst_34 = arith.constant dense<0.000000e+00> : vector<8x128xf32>
    %61 = tpu.matmul %54, %4, %cst_34 {dimension_numbers = #tpu.dot_dimension_numbers<[1], [0], [0], [1], [0, 0, 1, 1], [], []>} : vector<8x128xf32>, vector<128x128xf32>, vector<8x128xf32> -> vector<8x128xf32>
    %62 = arith.addf %60, %61 : vector<8x128xf32>
    %63 = math.tanh %62 : vector<8x128xf32>
    %64 = arith.index_cast %58 : i32 to index
    %c0_35 = arith.constant 0 : index
    %65 = vector.load %arg10[%64, %c0_35] : memref<128x128xf32, #tpu.memory_space<vmem>>, vector<8x128xf32>
    tpu.vector_store %arg10[%64, %c0_35], %63 {strides = array<i32>} : memref<128x128xf32, #tpu.memory_space<vmem>>, vector<8x128xf32>,
    %c6_i32 = arith.constant 6 : i32
    %c8_i32_36 = arith.constant 8 : i32
    %66 = arith.muli %c6_i32, %c8_i32_36 : i32
    %67 = tpu.assume_multiple %66, 8 : i32
    %68 = arith.index_cast %67 : i32 to index
    %c0_37 = arith.constant 0 : index
    %69 = vector.load %arg10[%68, %c0_37] : memref<128x128xf32, #tpu.memory_space<vmem>>, vector<8x128xf32>
    %cst_38 = arith.constant dense<0.000000e+00> : vector<8x128xf32>
    %70 = tpu.matmul %63, %4, %cst_38 {dimension_numbers = #tpu.dot_dimension_numbers<[1], [0], [0], [1], [0, 0, 1, 1], [], []>} : vector<8x128xf32>, vector<128x128xf32>, vector<8x128xf32> -> vector<8x128xf32>
    %71 = arith.addf %69, %70 : vector<8x128xf32>
    %72 = math.tanh %71 : vector<8x128xf32>
    %73 = arith.index_cast %67 : i32 to index
    %c0_39 = arith.constant 0 : index
    %74 = vector.load %arg10[%73, %c0_39] : memref<128x128xf32, #tpu.memory_space<vmem>>, vector<8x128xf32>
    tpu.vector_store %arg10[%73, %c0_39], %72 {strides = array<i32>} : memref<128x128xf32, #tpu.memory_space<vmem>>, vector<8x128xf32>,
    %c7_i32 = arith.constant 7 : i32
    %c8_i32_40 = arith.constant 8 : i32
    %75 = arith.muli %c7_i32, %c8_i32_40 : i32
    %76 = tpu.assume_multiple %75, 8 : i32
    %77 = arith.index_cast %76 : i32 to index
    %c0_41 = arith.constant 0 : index
    %78 = vector.load %arg10[%77, %c0_41] : memref<128x128xf32, #tpu.memory_space<vmem>>, vector<8x128xf32>
    %cst_42 = arith.constant dense<0.000000e+00> : vector<8x128xf32>
    %79 = tpu.matmul %72, %4, %cst_42 {dimension_numbers = #tpu.dot_dimension_numbers<[1], [0], [0], [1], [0, 0, 1, 1], [], []>} : vector<8x128xf32>, vector<128x128xf32>, vector<8x128xf32> -> vector<8x128xf32>
    %80 = arith.addf %78, %79 : vector<8x128xf32>
    %81 = math.tanh %80 : vector<8x128xf32>
    %82 = arith.index_cast %76 : i32 to index
    %c0_43 = arith.constant 0 : index
    %83 = vector.load %arg10[%82, %c0_43] : memref<128x128xf32, #tpu.memory_space<vmem>>, vector<8x128xf32>
    tpu.vector_store %arg10[%82, %c0_43], %81 {strides = array<i32>} : memref<128x128xf32, #tpu.memory_space<vmem>>, vector<8x128xf32>,
    %c8_i32_44 = arith.constant 8 : i32
    %c8_i32_45 = arith.constant 8 : i32
    %84 = arith.muli %c8_i32_44, %c8_i32_45 : i32
    %85 = tpu.assume_multiple %84, 8 : i32
    %86 = arith.index_cast %85 : i32 to index
    %c0_46 = arith.constant 0 : index
    %87 = vector.load %arg10[%86, %c0_46] : memref<128x128xf32, #tpu.memory_space<vmem>>, vector<8x128xf32>
    %cst_47 = arith.constant dense<0.000000e+00> : vector<8x128xf32>
    %88 = tpu.matmul %81, %4, %cst_47 {dimension_numbers = #tpu.dot_dimension_numbers<[1], [0], [0], [1], [0, 0, 1, 1], [], []>} : vector<8x128xf32>, vector<128x128xf32>, vector<8x128xf32> -> vector<8x128xf32>
    %89 = arith.addf %87, %88 : vector<8x128xf32>
    %90 = math.tanh %89 : vector<8x128xf32>
    %91 = arith.index_cast %85 : i32 to index
    %c0_48 = arith.constant 0 : index
    %92 = vector.load %arg10[%91, %c0_48] : memref<128x128xf32, #tpu.memory_space<vmem>>, vector<8x128xf32>
    tpu.vector_store %arg10[%91, %c0_48], %90 {strides = array<i32>} : memref<128x128xf32, #tpu.memory_space<vmem>>, vector<8x128xf32>,
    %c9_i32 = arith.constant 9 : i32
    %c8_i32_49 = arith.constant 8 : i32
    %93 = arith.muli %c9_i32, %c8_i32_49 : i32
    %94 = tpu.assume_multiple %93, 8 : i32
    %95 = arith.index_cast %94 : i32 to index
    %c0_50 = arith.constant 0 : index
    %96 = vector.load %arg10[%95, %c0_50] : memref<128x128xf32, #tpu.memory_space<vmem>>, vector<8x128xf32>
    %cst_51 = arith.constant dense<0.000000e+00> : vector<8x128xf32>
    %97 = tpu.matmul %90, %4, %cst_51 {dimension_numbers = #tpu.dot_dimension_numbers<[1], [0], [0], [1], [0, 0, 1, 1], [], []>} : vector<8x128xf32>, vector<128x128xf32>, vector<8x128xf32> -> vector<8x128xf32>
    %98 = arith.addf %96, %97 : vector<8x128xf32>
    %99 = math.tanh %98 : vector<8x128xf32>
    %100 = arith.index_cast %94 : i32 to index
    %c0_52 = arith.constant 0 : index
    %101 = vector.load %arg10[%100, %c0_52] : memref<128x128xf32, #tpu.memory_space<vmem>>, vector<8x128xf32>
    tpu.vector_store %arg10[%100, %c0_52], %99 {strides = array<i32>} : memref<128x128xf32, #tpu.memory_space<vmem>>, vector<8x128xf32>,
    %c10_i32 = arith.constant 10 : i32
    %c8_i32_53 = arith.constant 8 : i32
    %102 = arith.muli %c10_i32, %c8_i32_53 : i32
    %103 = tpu.assume_multiple %102, 8 : i32
    %104 = arith.index_cast %103 : i32 to index
    %c0_54 = arith.constant 0 : index
    %105 = vector.load %arg10[%104, %c0_54] : memref<128x128xf32, #tpu.memory_space<vmem>>, vector<8x128xf32>
    %cst_55 = arith.constant dense<0.000000e+00> : vector<8x128xf32>
    %106 = tpu.matmul %99, %4, %cst_55 {dimension_numbers = #tpu.dot_dimension_numbers<[1], [0], [0], [1], [0, 0, 1, 1], [], []>} : vector<8x128xf32>, vector<128x128xf32>, vector<8x128xf32> -> vector<8x128xf32>
    %107 = arith.addf %105, %106 : vector<8x128xf32>
    %108 = math.tanh %107 : vector<8x128xf32>
    %109 = arith.index_cast %103 : i32 to index
    %c0_56 = arith.constant 0 : index
    %110 = vector.load %arg10[%109, %c0_56] : memref<128x128xf32, #tpu.memory_space<vmem>>, vector<8x128xf32>
    tpu.vector_store %arg10[%109, %c0_56], %108 {strides = array<i32>} : memref<128x128xf32, #tpu.memory_space<vmem>>, vector<8x128xf32>,
    %c11_i32 = arith.constant 11 : i32
    %c8_i32_57 = arith.constant 8 : i32
    %111 = arith.muli %c11_i32, %c8_i32_57 : i32
    %112 = tpu.assume_multiple %111, 8 : i32
    %113 = arith.index_cast %112 : i32 to index
    %c0_58 = arith.constant 0 : index
    %114 = vector.load %arg10[%113, %c0_58] : memref<128x128xf32, #tpu.memory_space<vmem>>, vector<8x128xf32>
    %cst_59 = arith.constant dense<0.000000e+00> : vector<8x128xf32>
    %115 = tpu.matmul %108, %4, %cst_59 {dimension_numbers = #tpu.dot_dimension_numbers<[1], [0], [0], [1], [0, 0, 1, 1], [], []>} : vector<8x128xf32>, vector<128x128xf32>, vector<8x128xf32> -> vector<8x128xf32>
    %116 = arith.addf %114, %115 : vector<8x128xf32>
    %117 = math.tanh %116 : vector<8x128xf32>
    %118 = arith.index_cast %112 : i32 to index
    %c0_60 = arith.constant 0 : index
    %119 = vector.load %arg10[%118, %c0_60] : memref<128x128xf32, #tpu.memory_space<vmem>>, vector<8x128xf32>
    tpu.vector_store %arg10[%118, %c0_60], %117 {strides = array<i32>} : memref<128x128xf32, #tpu.memory_space<vmem>>, vector<8x128xf32>,
    %c12_i32 = arith.constant 12 : i32
    %c8_i32_61 = arith.constant 8 : i32
    %120 = arith.muli %c12_i32, %c8_i32_61 : i32
    %121 = tpu.assume_multiple %120, 8 : i32
    %122 = arith.index_cast %121 : i32 to index
    %c0_62 = arith.constant 0 : index
    %123 = vector.load %arg10[%122, %c0_62] : memref<128x128xf32, #tpu.memory_space<vmem>>, vector<8x128xf32>
    %cst_63 = arith.constant dense<0.000000e+00> : vector<8x128xf32>
    %124 = tpu.matmul %117, %4, %cst_63 {dimension_numbers = #tpu.dot_dimension_numbers<[1], [0], [0], [1], [0, 0, 1, 1], [], []>} : vector<8x128xf32>, vector<128x128xf32>, vector<8x128xf32> -> vector<8x128xf32>
    %125 = arith.addf %123, %124 : vector<8x128xf32>
    %126 = math.tanh %125 : vector<8x128xf32>
    %127 = arith.index_cast %121 : i32 to index
    %c0_64 = arith.constant 0 : index
    %128 = vector.load %arg10[%127, %c0_64] : memref<128x128xf32, #tpu.memory_space<vmem>>, vector<8x128xf32>
    tpu.vector_store %arg10[%127, %c0_64], %126 {strides = array<i32>} : memref<128x128xf32, #tpu.memory_space<vmem>>, vector<8x128xf32>,
    %c13_i32 = arith.constant 13 : i32
    %c8_i32_65 = arith.constant 8 : i32
    %129 = arith.muli %c13_i32, %c8_i32_65 : i32
    %130 = tpu.assume_multiple %129, 8 : i32
    %131 = arith.index_cast %130 : i32 to index
    %c0_66 = arith.constant 0 : index
    %132 = vector.load %arg10[%131, %c0_66] : memref<128x128xf32, #tpu.memory_space<vmem>>, vector<8x128xf32>
    %cst_67 = arith.constant dense<0.000000e+00> : vector<8x128xf32>
    %133 = tpu.matmul %126, %4, %cst_67 {dimension_numbers = #tpu.dot_dimension_numbers<[1], [0], [0], [1], [0, 0, 1, 1], [], []>} : vector<8x128xf32>, vector<128x128xf32>, vector<8x128xf32> -> vector<8x128xf32>
    %134 = arith.addf %132, %133 : vector<8x128xf32>
    %135 = math.tanh %134 : vector<8x128xf32>
    %136 = arith.index_cast %130 : i32 to index
    %c0_68 = arith.constant 0 : index
    %137 = vector.load %arg10[%136, %c0_68] : memref<128x128xf32, #tpu.memory_space<vmem>>, vector<8x128xf32>
    tpu.vector_store %arg10[%136, %c0_68], %135 {strides = array<i32>} : memref<128x128xf32, #tpu.memory_space<vmem>>, vector<8x128xf32>,
    %c14_i32 = arith.constant 14 : i32
    %c8_i32_69 = arith.constant 8 : i32
    %138 = arith.muli %c14_i32, %c8_i32_69 : i32
    %139 = tpu.assume_multiple %138, 8 : i32
    %140 = arith.index_cast %139 : i32 to index
    %c0_70 = arith.constant 0 : index
    %141 = vector.load %arg10[%140, %c0_70] : memref<128x128xf32, #tpu.memory_space<vmem>>, vector<8x128xf32>
    %cst_71 = arith.constant dense<0.000000e+00> : vector<8x128xf32>
    %142 = tpu.matmul %135, %4, %cst_71 {dimension_numbers = #tpu.dot_dimension_numbers<[1], [0], [0], [1], [0, 0, 1, 1], [], []>} : vector<8x128xf32>, vector<128x128xf32>, vector<8x128xf32> -> vector<8x128xf32>
    %143 = arith.addf %141, %142 : vector<8x128xf32>
    %144 = math.tanh %143 : vector<8x128xf32>
    %145 = arith.index_cast %139 : i32 to index
    %c0_72 = arith.constant 0 : index
    %146 = vector.load %arg10[%145, %c0_72] : memref<128x128xf32, #tpu.memory_space<vmem>>, vector<8x128xf32>
    tpu.vector_store %arg10[%145, %c0_72], %144 {strides = array<i32>} : memref<128x128xf32, #tpu.memory_space<vmem>>, vector<8x128xf32>,
    %c15_i32 = arith.constant 15 : i32
    %c8_i32_73 = arith.constant 8 : i32
    %147 = arith.muli %c15_i32, %c8_i32_73 : i32
    %148 = tpu.assume_multiple %147, 8 : i32
    %149 = arith.index_cast %148 : i32 to index
    %c0_74 = arith.constant 0 : index
    %150 = vector.load %arg10[%149, %c0_74] : memref<128x128xf32, #tpu.memory_space<vmem>>, vector<8x128xf32>
    %cst_75 = arith.constant dense<0.000000e+00> : vector<8x128xf32>
    %151 = tpu.matmul %144, %4, %cst_75 {dimension_numbers = #tpu.dot_dimension_numbers<[1], [0], [0], [1], [0, 0, 1, 1], [], []>} : vector<8x128xf32>, vector<128x128xf32>, vector<8x128xf32> -> vector<8x128xf32>
    %152 = arith.addf %150, %151 : vector<8x128xf32>
    %153 = math.tanh %152 : vector<8x128xf32>
    %154 = arith.index_cast %148 : i32 to index
    %c0_76 = arith.constant 0 : index
    %155 = vector.load %arg10[%154, %c0_76] : memref<128x128xf32, #tpu.memory_space<vmem>>, vector<8x128xf32>
    tpu.vector_store %arg10[%154, %c0_76], %153 {strides = array<i32>} : memref<128x128xf32, #tpu.memory_space<vmem>>, vector<8x128xf32>,
    %c16_i32 = arith.constant 16 : i32
    %c0_i32_77 = arith.constant 0 : i32
    %156 = arith.cmpi ne, %arg0, %c0_i32_77 : i32
    %157 = arith.extui %156 : i1 to i32
    %c0_i32_78 = arith.constant 0 : i32
    %158 = arith.cmpi ne, %157, %c0_i32_78 : i32
    scf.if %158 {
      %c0_90 = arith.constant 0 : index
      %c0_91 = arith.constant 0 : index
      %172 = vector.load %arg9[%c0_90, %c0_91] : memref<8x128xf32, #tpu.memory_space<vmem>>, vector<8x128xf32>
      tpu.vector_store %arg9[%c0_90, %c0_91], %153 {strides = array<i32>} : memref<8x128xf32, #tpu.memory_space<vmem>>, vector<8x128xf32>,
    } else {
    }
    %c0_i32_79 = arith.constant 0 : i32
    %159 = arith.cmpi eq, %arg0, %c0_i32_79 : i32
    %160 = arith.extui %159 : i1 to i32
    %c0_i32_80 = arith.constant 0 : i32
    %161 = arith.cmpi ne, %160, %c0_i32_80 : i32
    scf.if %161 {
      %c56 = arith.constant 56 : index
      %c0_90 = arith.constant 0 : index
      %172 = vector.load %arg10[%c56, %c0_90] : memref<128x128xf32, #tpu.memory_space<vmem>>, vector<8x128xf32>
      %c0_91 = arith.constant 0 : index
      %c0_92 = arith.constant 0 : index
      %173 = vector.load %arg9[%c0_91, %c0_92] : memref<8x128xf32, #tpu.memory_space<vmem>>, vector<8x128xf32>
      tpu.vector_store %arg9[%c0_91, %c0_92], %172 {strides = array<i32>} : memref<8x128xf32, #tpu.memory_space<vmem>>, vector<8x128xf32>,
    } else {
    }
    %c0_81 = arith.constant 0 : index
    %c0_82 = arith.constant 0 : index
    %162 = vector.load %arg10[%c0_81, %c0_82] : memref<128x128xf32, #tpu.memory_space<vmem>>, vector<128x128xf32>
    %c0_83 = arith.constant 0 : index
    %c0_84 = arith.constant 0 : index
    %163 = vector.load %arg6[%c0_83, %c0_84] : memref<1x128xf32, #tpu.memory_space<vmem>>, vector<1x128xf32>
    %164 = vector.broadcast %163 : vector<1x128xf32> to vector<128x128xf32>
    %165 = arith.mulf %162, %164 : vector<128x128xf32>
    %cst_85 = arith.constant dense<0.000000e+00> : vector<128xf32>
    %166 = vector.multi_reduction <add>, %165, %cst_85 [1] : vector<128x128xf32> to vector<128xf32>
    %c0_86 = arith.constant 0 : index
    %167 = memref.load %arg7[%c0_86] : memref<1xf32, #tpu.memory_space<smem>>
    %168 = vector.broadcast %167 : f32 to vector<128xf32>
    %169 = arith.addf %166, %168 : vector<128xf32>
    %170 = vector.shape_cast %169 : vector<128xf32> to vector<1x1x128xf32>
    %c0_87 = arith.constant 0 : index
    %c0_88 = arith.constant 0 : index
    %c0_89 = arith.constant 0 : index
    %171 = vector.load %arg8[%c0_87, %c0_88, %c0_89] : memref<1x1x128xf32, #tpu.memory_space<vmem>>, vector<1x1x128xf32>
    tpu.vector_store %arg8[%c0_87, %c0_88, %c0_89], %170 {strides = array<i32>} : memref<1x1x128xf32, #tpu.memory_space<vmem>>, vector<1x1x128xf32>,
    return
  }
  func.func @transform_0(%arg0: i32) -> (i32, i32) {
    %c0_i32 = arith.constant 0 : i32
    %c0_i32_0 = arith.constant 0 : i32
    return %arg0, %c0_i32 : i32, i32
  }
  func.func @transform_1(%arg0: i32) -> (i32, i32) {
    %c0_i32 = arith.constant 0 : i32
    %c0_i32_0 = arith.constant 0 : i32
    %c0_i32_1 = arith.constant 0 : i32
    return %c0_i32, %c0_i32_0 : i32, i32
  }
  func.func @transform_2(%arg0: i32) -> (i32, i32) {
    %c0_i32 = arith.constant 0 : i32
    %c0_i32_0 = arith.constant 0 : i32
    %c0_i32_1 = arith.constant 0 : i32
    return %c0_i32, %c0_i32_0 : i32, i32
  }
  func.func @transform_3(%arg0: i32) -> (i32, i32) {
    %c0_i32 = arith.constant 0 : i32
    %c0_i32_0 = arith.constant 0 : i32
    %c0_i32_1 = arith.constant 0 : i32
    return %c0_i32, %c0_i32_0 : i32, i32
  }
  func.func @transform_4(%arg0: i32) -> (i32, i32) {
    %c0_i32 = arith.constant 0 : i32
    %c0_i32_0 = arith.constant 0 : i32
    %c0_i32_1 = arith.constant 0 : i32
    return %c0_i32, %c0_i32_0 : i32, i32
  }
  func.func @transform_5(%arg0: i32) -> (i32, i32) {
    %c0_i32 = arith.constant 0 : i32
    %c0_i32_0 = arith.constant 0 : i32
    %c0_i32_1 = arith.constant 0 : i32
    return %c0_i32, %c0_i32_0 : i32, i32
  }
  func.func @transform_6(%arg0: i32) -> i32 {
    %c0_i32 = arith.constant 0 : i32
    %c0_i32_0 = arith.constant 0 : i32
    return %c0_i32 : i32
  }
  func.func @transform_7(%arg0: i32) -> (i32, i32, i32) {
    %c0_i32 = arith.constant 0 : i32
    %c0_i32_0 = arith.constant 0 : i32
    %c0_i32_1 = arith.constant 0 : i32
    return %arg0, %c0_i32, %c0_i32_0 : i32, i32, i32
  }
  func.func @transform_8(%arg0: i32) -> (i32, i32) {
    %c0_i32 = arith.constant 0 : i32
    %c0_i32_0 = arith.constant 0 : i32
    %c0_i32_1 = arith.constant 0 : i32
    return %c0_i32, %c0_i32_0 : i32, i32
  }
}

</mosaic_0001>

<bundles_post_ra>
// kernel: tpu_custom_call.1
= control target key start
LH: loop header
LB: loop body
LE: loop exit
PB: predicated region body
PF: predicated region fallthrough
CT: control target
= control target key end

     0   :  { %15 = vsyncpa [#allocation5], 0  ;;  %v3105_v3 = vmov 0.0|0.0   ;;  %vm3106_vm0 = vmmov 0   ;;  %v3107_v6 = vmov 0.0   ;;  %vm77_vm1 = vcmask 64512   ;;  %s3740_s0 = inlined_call_operand.vmem [shape: f32[128,8], index: 0, kind: input, shape index: {}]   ;;  %s3741_s1 = inlined_call_operand.vmem [shape: f32[8,128], index: 1, kind: input, shape index: {}]   ;;  %s3742_s2 = inlined_call_operand.vmem [shape: f32[8,128], index: 2, kind: input, shape index: {}]   ;;  %s3743_s3 = inlined_call_operand.vmem [shape: f32[128,128], index: 3, kind: input, shape index: {}]   ;;  %s3744_s4 = inlined_call_operand.vmem [shape: f32[1,128], index: 4, kind: input, shape index: {}]   ;;  %s3745_s5 = inlined_call_operand.vmem [shape: f32[1,128], index: 5, kind: input, shape index: {}]   ;;  %s3746_s6 = inlined_call_operand.<no memory space> [shape: f32[1], index: 6, kind: input, shape index: {}]   ;;  %s3747_s7 = inlined_call_operand.hbm [shape: f32[1,1,128], index: 7, kind: output, shape index: {0}]   ;;  %s3748_s8 = inlined_call_operand.hbm [shape: f32[8,128], index: 8, kind: output, shape index: {1}]  }
   0x1   :  { %v38_v0 = vld [vmem:[%s3743_s3] sm:$0xff]  ;;  %v39_v1 = vld [vmem:[%s3743_s3 + $0x8] sm:$0xff]  ;;  %v40_v2 = vld [vmem:[%s3743_s3 + $0x10] sm:$0xff]  ;;  %2636 = vmatprep.subr.bf16.mxu1 %v3105_v3  ;;  %2108 = vmatprep.mubr.msk.f32.mxu1 %vm3106_vm0, %v3107_v6 }
   0x2   :  { %v3165_v4 = vpack.c.bf16 %v39_v1, %v38_v0  ;;  %v41_v5 = vld [vmem:[%s3743_s3 + $0x18] sm:$0xff]  ;;  %v42_v8 = vld [vmem:[%s3743_s3 + $0x20] sm:$0xff]  ;;  %v43_v9 = vld [vmem:[%s3743_s3 + $0x28] sm:$0xff] }
   0x3   :  { %v3173_v7 = vpack.c.bf16 %v41_v5, %v40_v2  ;;  %v37_v10 = vld [vmem:[%s3742_s2] sm:$0xff]  ;;  %v56_v12 = vld [vmem:[%s3740_s0 + $0x8] sm:$0xff]  ;;  %v57_v13 = vld [vmem:[%s3740_s0 + $0x10] sm:$0xff]  ;;  %v3196_v14 = vpack.c.bf16 %v43_v9, %v42_v8 }
   0x4   :  { %2638 = vmatpush3.bf16.msra.mxu1 %v3165_v4  ;;  %2050 = vmatprep.subr.mxu0 %v37_v10  ;;  %v55_v11 = vld [vmem:[%s3740_s0] sm:$0xff]  ;;  %v44_v15 = vld [vmem:[%s3743_s3 + $0x30] sm:$0xff]  ;;  %v45_v16 = vld [vmem:[%s3743_s3 + $0x38] sm:$0xff] }
   0x5   :  { %2639 = vmatprep.subr.bf16.mxu1 %v3105_v3  ;;  %2051 = vmatpush3.msra.mxu0 %v37_v10  ;;  %v58_v17 = vld [vmem:[%s3740_s0 + $0x18] sm:$0xff] }
   0x6   :  { %2052 = vmatprep.mubr.msk.f32.mxu0 %vm77_vm1, %v55_v11  ;;  %2660 = vmatprep.subr.bf16.mxu0 %v3105_v3 }
   0x7   :  { %2053 = vmatmul.mubr.msk.f32.vlgmr.msra.gmra.mrb[0].mxu0 %vm77_vm1, %v56_v12 }
   0x8   :  { %2641 = vmatpush3.bf16.msra.mxu1 %v3173_v7 }
   0x9   :  { %2642 = vmatprep.subr.bf16.mxu1 %v3105_v3 }
   0xa   :  { %16 = vsyncpa [#allocation7], 0  ;;  %2662 = vmatpush3.bf16.msra.mxu0 %v3165_v4  ;;  %2055 = vmatprep.mubr.msk.f32.mxu0 %vm77_vm1, %v57_v13  ;;  %v59_v18 = vld [vmem:[%s3740_s0 + $0x20] sm:$0xff]  ;;  %v3217_v19 = vpack.c.bf16 %v45_v16, %v44_v15  ;;  %v47_v21 = vld [vmem:[%s3743_s3 + $0x48] sm:$0xff] }
   0xb   :  { %2663 = vmatprep.subr.bf16.mxu0 %v3105_v3  ;;  %2056 = vmatmul.mubr.msk.f32.gmra.mrb[2].mxu0 %vm77_vm1, %v58_v17  ;;  %v46_v20 = vld [vmem:[%s3743_s3 + $0x40] sm:$0xff]  ;;  %v60_v22 = vld [vmem:[%s3740_s0 + $0x28] sm:$0xff]  ;;  %v61_v23 = vld [vmem:[%s3740_s0 + $0x30] sm:$0xff] }
   0xc   :  { %2644 = vmatpush3.bf16.msra.mxu1 %v3196_v14  ;;  %2058 = vmatprep.mubr.msk.f32.mxu0 %vm77_vm1, %v59_v18  ;;  %v3237_v24 = vpack.c.bf16 %v47_v21, %v46_v20  ;;  %v48_v25 = vld [vmem:[%s3743_s3 + $0x50] sm:$0xff]  ;;  %v49_v26 = vld [vmem:[%s3743_s3 + $0x58] sm:$0xff]  ;;  %v50_v29 = vld [vmem:[%s3743_s3 + $0x60] sm:$0xff] }
   0xd   :  { %2645 = vmatprep.subr.bf16.mxu1 %v3105_v3  ;;  %v62_v27 = vld [vmem:[%s3740_s0 + $0x38] sm:$0xff]  ;;  %v3254_v28 = vpack.c.bf16 %v49_v26, %v48_v25  ;;  %v51_v30 = vld [vmem:[%s3743_s3 + $0x68] sm:$0xff]  ;;  %v52_v32 = vld [vmem:[%s3743_s3 + $0x70] sm:$0xff] }
   0xe   :  { %2665 = vmatpush3.bf16.msra.mxu0 %v3173_v7  ;;  %v3267_v31 = vpack.c.bf16 %v51_v30, %v50_v29  ;;  %v53_v33 = vld [vmem:[%s3743_s3 + $0x78] sm:$0xff]  ;;  %v35_v35 = vld [vmem:[%s3741_s1] sm:$0xff]  ;;  %v64_v37 = vld [vmem:[%s3740_s0 + $0x48] sm:$0xff] }
   0xf   :  { %2666 = vmatprep.subr.bf16.mxu0 %v3105_v3  ;;  %2059 = vmatmul.mubr.msk.f32.gmra.mrb[4].mxu0 %vm77_vm1, %v60_v22  ;;  %v3279_v34 = vpack.c.bf16 %v53_v33, %v52_v32  ;;  %v63_v36 = vld [vmem:[%s3740_s0 + $0x40] sm:$0xff]  ;;  %v65_v38 = vld [vmem:[%s3740_s0 + $0x50] sm:$0xff]  ;;  %v66_v39 = vld [vmem:[%s3740_s0 + $0x58] sm:$0xff] }
  0x10   :  { %2647 = vmatpush3.bf16.msra.mxu1 %v3217_v19  ;;  %2061 = vmatprep.mubr.msk.f32.mxu0 %vm77_vm1, %v61_v23  ;;  %v67_v40 = vld [vmem:[%s3740_s0 + $0x60] sm:$0xff]  ;;  %v68_v41 = vld [vmem:[%s3740_s0 + $0x68] sm:$0xff]  ;;  %v69_v42 = vld [vmem:[%s3740_s0 + $0x70] sm:$0xff] }
  0x11   :  { %2648 = vmatprep.subr.bf16.mxu1 %v3105_v3  ;;  %v70_v43 = vld [vmem:[%s3740_s0 + $0x78] sm:$0xff]  ;;  %v3348_v46 = vld [vmem:[%s3744_s4] ss:$0 sm:$0xff]  ;;  %s3108_s4 = smov [#allocation6]  }
  0x12   :  { %2668 = vmatpush3.bf16.msra.mxu0 %v3196_v14  ;;  %v3354_v51 = vld [vmem:[%s3745_s5] ss:$0 sm:$0xff]  ;;  %s1731_s5 = sshll.u32 %s3108_s4, 4  ;;  %s1732_s5 = int_to_ptr.vmem [resolvable:$true] %s1731_s5 }
  0x13   :  { %2669 = vmatprep.subr.bf16.mxu0 %v3105_v3  ;;  %2062 = vmatmul.mubr.msk.f32.gmra.mrb[6].mxu0 %vm77_vm1, %v62_v27  ;;  %s3057_s27 = scalar_lea.vmem %s1732_s5, 128  ;;  %p3062_p1 = scmp.lt.s32.totalorder %s1732_s5, %s1732_s5 }
  0x14   :  { %2650 = vmatpush3.bf16.msra.mxu1 %v3237_v24  ;;  %2064 = vmatprep.mubr.msk.f32.mxu0 %vm77_vm1, %v63_v36  ;;  %p3058_p0 = scmp.ne.s32.totalorder %s1732_s5, %s3057_s27  ;;  %p3063_p2 = scmp.lt.s32.totalorder %s3057_s27, %s3057_s27 }
  0x15   :  { %2651 = vmatprep.subr.bf16.mxu1 %v3105_v3 }
  0x16   :  { %2671 = vmatpush3.bf16.msra.mxu0 %v3217_v19  ;;  %p3064_p3 = por %p3063_p2, %p3062_p1 }
  0x17   :  { %2672 = vmatprep.subr.bf16.mxu0 %v3105_v3  ;;  %2065 = vmatmul.mubr.msk.f32.gmra.mrb[8].mxu0 %vm77_vm1, %v64_v37 }
  0x18   :  { %2653 = vmatpush3.bf16.msra.mxu1 %v3254_v28  ;;  %2067 = vmatprep.mubr.msk.f32.mxu0 %vm77_vm1, %v65_v38  ;;  %p3065_p4 = pnand %p3064_p3, %p3058_p0 }
  0x19   :  { %2654 = vmatprep.subr.bf16.mxu1 %v3105_v3 }
  0x1a   :  { %2674 = vmatpush3.bf16.msra.mxu0 %v3237_v24 }
  0x1b   :  { %2675 = vmatprep.subr.bf16.mxu0 %v3105_v3  ;;  %2068 = vmatmul.mubr.msk.f32.gmra.mrb[10].mxu0 %vm77_vm1, %v66_v39 }
  0x1c   :  { %2656 = vmatpush3.bf16.msra.mxu1 %v3267_v31  ;;  %2070 = vmatprep.mubr.msk.f32.mxu0 %vm77_vm1, %v67_v40 }
  0x1d   :  { %2657 = vmatprep.subr.bf16.mxu1 %v3105_v3 }
  0x1e   :  { %2677 = vmatpush3.bf16.msra.mxu0 %v3254_v28 }
  0x1f   :  { %2678 = vmatprep.subr.bf16.mxu0 %v3105_v3  ;;  %2071 = vmatmul.mubr.msk.f32.gmra.mrb[12].mxu0 %vm77_vm1, %v68_v41 }
  0x20   :  { %2659 = vmatpush3.bf16.msra.mxu1 %v3279_v34  ;;  %2073 = vmatprep.mubr.msk.f32.mxu0 %vm77_vm1, %v69_v42 }
  0x21   :  { %2684 = vmatprep.subr.bf16.mxu1 %v3105_v3 }
  0x22   :  { %2680 = vmatpush3.bf16.msra.mxu0 %v3267_v31 }
  0x23   :  { %2109 = vmatmul.mubr.f32.vlgmr.msra.gmra.mrb[0].mxu1 %v35_v35  ;;  %2681 = vmatprep.subr.bf16.mxu0 %v3105_v3 }
  0x24   :  { %2686 = vmatpush3.bf16.msra.mxu1 %v3165_v4  ;;  %2178 = vmatprep.mubr.msk.f32.mxu1 %vm3106_vm0, %v3107_v6 }
  0x25   :  { %2687 = vmatprep.subr.bf16.mxu1 %v3105_v3  ;;  %2074 = vmatmul.mubr.msk.f32.gmra.mrb[14].mxu0 %vm77_vm1, %v70_v43 }
  0x26   :  { %2683 = vmatpush3.bf16.msra.mxu0 %v3279_v34  ;;  %2143 = vmatprep.mubr.msk.f32.mxu0 %vm3106_vm0, %v3107_v6 }
  0x27   :  { %2708 = vmatprep.subr.bf16.mxu0 %v3105_v3 }
  0x28   :  { %2689 = vmatpush3.bf16.msra.mxu1 %v3173_v7 }
  0x29   :  { %2690 = vmatprep.subr.bf16.mxu1 %v3105_v3 }
  0x2c   :  { %2692 = vmatpush3.bf16.msra.mxu1 %v3196_v14 }
  0x2d   :  { %2693 = vmatprep.subr.bf16.mxu1 %v3105_v3 }
  0x30   :  { %2695 = vmatpush3.bf16.msra.mxu1 %v3217_v19 }
  0x31   :  { %2696 = vmatprep.subr.bf16.mxu1 %v3105_v3 }
  0x34   :  { %2698 = vmatpush3.bf16.msra.mxu1 %v3237_v24 }
  0x35   :  { %2699 = vmatprep.subr.bf16.mxu1 %v3105_v3 }
  0x38   :  { %2701 = vmatpush3.bf16.msra.mxu1 %v3254_v28 }
  0x39   :  { %2702 = vmatprep.subr.bf16.mxu1 %v3105_v3 }
  0x3c   :  { %2704 = vmatpush3.bf16.msra.mxu1 %v3267_v31 }
  0x3d   :  { %2705 = vmatprep.subr.bf16.mxu1 %v3105_v3 }
  0x40   :  { %2707 = vmatpush3.bf16.msra.mxu1 %v3279_v34 }
  0x41   :  { %2732 = vmatprep.subr.bf16.mxu1 %v3105_v3 }
  0xda   :  { %v2054_v44 = vpop.f32.mrb[0].mxu0 }
  0xdb   :  { %v192_v45 = vpop.f32.mrb[1].mxu0  ;;  %v198_v8 = vadd.f32 %v2054_v44, %v3348_v46 }
  0xdc   :  { %v193_v47 = vadd.f32 %v3348_v46, %v192_v45 }
  0xde   :  { %v3368_v54 = vpop.f32.mrb[2].mxu0 }
  0xdf   :  { %v202_v55 = vpop.f32.mrb[3].mxu0  ;;  %v208_v22 = vadd.f32 %v3368_v54, %v3348_v46 }
  0xe0   :  { %v203_v15 = vadd.f32 %v3348_v46, %v202_v55 }
  0xe2   :  { %v3371_v56 = vpop.f32.mrb[4].mxu0 }
  0xe3   :  { %v3373_v57 = vpop.f32.mrb[5].mxu0  ;;  %v218_v38 = vadd.f32 %v3371_v56, %v3348_v46 }
  0xe4   :  { %v213_v30 = vadd.f32 %v3348_v46, %v3373_v57 }
  0xe6   :  { %v3376_v58 = vpop.f32.mrb[6].mxu0 }
  0xe7   :  { %v3379_v59 = vpop.f32.mrb[7].mxu0 }
  0xe8   :  { %v223_v44 = vadd.f32 %v3348_v46, %v3379_v59 }
  0xea   :  { %v3385_v60 = vpop.f32.mrb[8].mxu0 }
  0xeb   :  { %v3387_v61 = vpop.f32.mrb[9].mxu0 }
  0xee   :  { %v3389_v62 = vpop.f32.mrb[10].mxu0 }
  0xef   :  { %v3391_v63 = vpop.f32.mrb[11].mxu0 }
  0xf2   :  { %v3393_v0 = vpop.f32.mrb[12].mxu0 }
  0xf3   :  { %v3395_v1 = vpop.f32.mrb[13].mxu0 }
  0xf6   :  { %v355_v48 = vpop.f32.mrb[0].mxu1 }
  0xf7   :  { %v359_v49 = vadd.f32 %v355_v48, %v193_v47  ;;  %v2110_v50 = vpop.f32.mrb[1].mxu1 }
  0xf8   :  { %v3397_v2 = vpop.f32.mrb[14].mxu0 }
  0xf9   :  { %3025 = vtanh.f32 %v359_v49  ;;  %v3399_v5 = vpop.f32.mrb[15].mxu0 }
 0x103   :  { %v3026_v52 = vpop.eup %3025 }
 0x104   :  { %2144 = vmatmul.mubr.f32.vlgmr.msra.gmra.mrb[16].mxu0 %v3026_v52  ;;  %v1520_v53 = vmul.f32 %v3026_v52, %v3354_v51  ;;  %v228_v52 = vadd.f32 %v3376_v58, %v3348_v46  ;;  %v233_v58 = vadd.f32 %v3348_v46, %v3387_v61  ;;  %v238_v61 = vadd.f32 %v3385_v60, %v3348_v46 }
 0x105   :  { %2710 = vmatpush3.bf16.msra.mxu0 %v3165_v4  ;;  %2213 = vmatprep.mubr.msk.f32.mxu0 %vm3106_vm0, %v3107_v6  ;;  %v243_v60 = vadd.f32 %v3348_v46, %v3391_v63  ;;  %v248_v63 = vadd.f32 %v3389_v62, %v3348_v46  ;;  %v253_v62 = vadd.f32 %v3348_v46, %v3395_v1 }
 0x106   :  { %1536 = vadd.xlane.f32.xlu0 %v1520_v53  ;;  %2711 = vmatprep.subr.bf16.mxu0 %v3105_v3 }
 0x109   :  { %2713 = vmatpush3.bf16.msra.mxu0 %v3173_v7 }
 0x10a   :  { %2714 = vmatprep.subr.bf16.mxu0 %v3105_v3 }
 0x10d   :  { %2716 = vmatpush3.bf16.msra.mxu0 %v3196_v14 }
 0x10e   :  { %2717 = vmatprep.subr.bf16.mxu0 %v3105_v3 }
 0x111   :  { %2719 = vmatpush3.bf16.msra.mxu0 %v3217_v19 }
 0x112   :  { %2720 = vmatprep.subr.bf16.mxu0 %v3105_v3 }
 0x115   :  { %2722 = vmatpush3.bf16.msra.mxu0 %v3237_v24 }
 0x116   :  { %2723 = vmatprep.subr.bf16.mxu0 %v3105_v3 }
 0x119   :  { %2725 = vmatpush3.bf16.msra.mxu0 %v3254_v28 }
 0x11a   :  { %2726 = vmatprep.subr.bf16.mxu0 %v3105_v3 }
 0x11d   :  { %2728 = vmatpush3.bf16.msra.mxu0 %v3267_v31 }
 0x11e   :  { %2729 = vmatprep.subr.bf16.mxu0 %v3105_v3 }
 0x121   :  { %2731 = vmatpush3.bf16.msra.mxu0 %v3279_v34 }
 0x122   :  { %2756 = vmatprep.subr.bf16.mxu0 %v3105_v3 }
 0x1d7   :  { %v430_v9 = vpop.f32.mrb[16].mxu0 }
 0x1d8   :  { %v434_v10 = vadd.f32 %v430_v9, %v198_v8  ;;  %v2145_v11 = vpop.f32.mrb[17].mxu0 }
 0x1da   :  { %3027 = vtanh.f32 %v434_v10 }
 0x1e4   :  { %v3028_v12 = vpop.eup %3027 }
 0x1e5   :  { %2179 = vmatmul.mubr.f32.vlgmr.msra.gmra.mrb[2].mxu1 %v3028_v12  ;;  %v1521_v13 = vmul.f32 %v3028_v12, %v3354_v51 }
 0x1e6   :  { %2734 = vmatpush3.bf16.msra.mxu1 %v3165_v4  ;;  %2248 = vmatprep.mubr.msk.f32.mxu1 %vm3106_vm0, %v3107_v6 }
 0x1e7   :  { %1538 = vadd.xlane.f32.xlu0 %v1521_v13  ;;  %2735 = vmatprep.subr.bf16.mxu1 %v3105_v3 }
 0x1ea   :  { %2737 = vmatpush3.bf16.msra.mxu1 %v3173_v7 }
 0x1eb   :  { %2738 = vmatprep.subr.bf16.mxu1 %v3105_v3 }
 0x1ee   :  { %2740 = vmatpush3.bf16.msra.mxu1 %v3196_v14 }
 0x1ef   :  { %2741 = vmatprep.subr.bf16.mxu1 %v3105_v3 }
 0x1f2   :  { %2743 = vmatpush3.bf16.msra.mxu1 %v3217_v19 }
 0x1f3   :  { %2744 = vmatprep.subr.bf16.mxu1 %v3105_v3 }
 0x1f6   :  { %2746 = vmatpush3.bf16.msra.mxu1 %v3237_v24 }
 0x1f7   :  { %2747 = vmatprep.subr.bf16.mxu1 %v3105_v3 }
 0x1fa   :  { %2749 = vmatpush3.bf16.msra.mxu1 %v3254_v28 }
 0x1fb   :  { %2750 = vmatprep.subr.bf16.mxu1 %v3105_v3 }
 0x1fe   :  { %2752 = vmatpush3.bf16.msra.mxu1 %v3267_v31 }
 0x1ff   :  { %2753 = vmatprep.subr.bf16.mxu1 %v3105_v3 }
 0x202   :  { %2755 = vmatpush3.bf16.msra.mxu1 %v3279_v34 }
 0x203   :  { %2780 = vmatprep.subr.bf16.mxu1 %v3105_v3 }
 0x2b8   :  { %v505_v16 = vpop.f32.mrb[2].mxu1 }
 0x2b9   :  { %v509_v17 = vadd.f32 %v505_v16, %v203_v15  ;;  %v2180_v18 = vpop.f32.mrb[3].mxu1 }
 0x2bb   :  { %3029 = vtanh.f32 %v509_v17 }
 0x2c5   :  { %v3030_v20 = vpop.eup %3029 }
 0x2c6   :  { %2214 = vmatmul.mubr.f32.vlgmr.msra.gmra.mrb[18].mxu0 %v3030_v20  ;;  %v1522_v21 = vmul.f32 %v3030_v20, %v3354_v51 }
 0x2c7   :  { %2758 = vmatpush3.bf16.msra.mxu0 %v3165_v4  ;;  %2283 = vmatprep.mubr.msk.f32.mxu0 %vm3106_vm0, %v3107_v6 }
 0x2c8   :  { %1540 = vadd.xlane.f32.xlu1 %v1522_v21  ;;  %2759 = vmatprep.subr.bf16.mxu0 %v3105_v3 }
 0x2cb   :  { %2761 = vmatpush3.bf16.msra.mxu0 %v3173_v7 }
 0x2cc   :  { %2762 = vmatprep.subr.bf16.mxu0 %v3105_v3 }
 0x2cf   :  { %2764 = vmatpush3.bf16.msra.mxu0 %v3196_v14 }
 0x2d0   :  { %2765 = vmatprep.subr.bf16.mxu0 %v3105_v3 }
 0x2d3   :  { %2767 = vmatpush3.bf16.msra.mxu0 %v3217_v19 }
 0x2d4   :  { %2768 = vmatprep.subr.bf16.mxu0 %v3105_v3 }
 0x2d7   :  { %2770 = vmatpush3.bf16.msra.mxu0 %v3237_v24 }
 0x2d8   :  { %2771 = vmatprep.subr.bf16.mxu0 %v3105_v3 }
 0x2db   :  { %2773 = vmatpush3.bf16.msra.mxu0 %v3254_v28 }
 0x2dc   :  { %2774 = vmatprep.subr.bf16.mxu0 %v3105_v3 }
 0x2df   :  { %2776 = vmatpush3.bf16.msra.mxu0 %v3267_v31 }
 0x2e0   :  { %2777 = vmatprep.subr.bf16.mxu0 %v3105_v3 }
 0x2e3   :  { %2779 = vmatpush3.bf16.msra.mxu0 %v3279_v34 }
 0x2e4   :  { %2804 = vmatprep.subr.bf16.mxu0 %v3105_v3 }
 0x399   :  { %v580_v23 = vpop.f32.mrb[18].mxu0 }
 0x39a   :  { %v584_v25 = vadd.f32 %v580_v23, %v208_v22  ;;  %v2215_v26 = vpop.f32.mrb[19].mxu0 }
 0x39c   :  { %3031 = vtanh.f32 %v584_v25 }
 0x3a6   :  { %v3032_v27 = vpop.eup %3031 }
 0x3a7   :  { %2249 = vmatmul.mubr.f32.vlgmr.msra.gmra.mrb[4].mxu1 %v3032_v27  ;;  %v1523_v29 = vmul.f32 %v3032_v27, %v3354_v51 }
 0x3a8   :  { %2782 = vmatpush3.bf16.msra.mxu1 %v3165_v4  ;;  %2318 = vmatprep.mubr.msk.f32.mxu1 %vm3106_vm0, %v3107_v6 }
 0x3a9   :  { %1542 = vadd.xlane.f32.xlu1 %v1523_v29  ;;  %2783 = vmatprep.subr.bf16.mxu1 %v3105_v3 }
 0x3ac   :  { %2785 = vmatpush3.bf16.msra.mxu1 %v3173_v7 }
 0x3ad   :  { %2786 = vmatprep.subr.bf16.mxu1 %v3105_v3 }
 0x3b0   :  { %2788 = vmatpush3.bf16.msra.mxu1 %v3196_v14 }
 0x3b1   :  { %2789 = vmatprep.subr.bf16.mxu1 %v3105_v3 }
 0x3b4   :  { %2791 = vmatpush3.bf16.msra.mxu1 %v3217_v19 }
 0x3b5   :  { %2792 = vmatprep.subr.bf16.mxu1 %v3105_v3 }
 0x3b8   :  { %2794 = vmatpush3.bf16.msra.mxu1 %v3237_v24 }
 0x3b9   :  { %2795 = vmatprep.subr.bf16.mxu1 %v3105_v3 }
 0x3bc   :  { %2797 = vmatpush3.bf16.msra.mxu1 %v3254_v28 }
 0x3bd   :  { %2798 = vmatprep.subr.bf16.mxu1 %v3105_v3 }
 0x3c0   :  { %2800 = vmatpush3.bf16.msra.mxu1 %v3267_v31 }
 0x3c1   :  { %2801 = vmatprep.subr.bf16.mxu1 %v3105_v3 }
 0x3c4   :  { %2803 = vmatpush3.bf16.msra.mxu1 %v3279_v34 }
 0x3c5   :  { %2828 = vmatprep.subr.bf16.mxu1 %v3105_v3 }
 0x47a   :  { %v655_v32 = vpop.f32.mrb[4].mxu1 }
 0x47b   :  { %v659_v33 = vadd.f32 %v655_v32, %v213_v30  ;;  %v2250_v35 = vpop.f32.mrb[5].mxu1 }
 0x47d   :  { %3033 = vtanh.f32 %v659_v33 }
 0x487   :  { %v3034_v36 = vpop.eup %3033 }
 0x488   :  { %2284 = vmatmul.mubr.f32.vlgmr.msra.gmra.mrb[20].mxu0 %v3034_v36  ;;  %v1524_v37 = vmul.f32 %v3034_v36, %v3354_v51 }
 0x489   :  { %2806 = vmatpush3.bf16.msra.mxu0 %v3165_v4  ;;  %2353 = vmatprep.mubr.msk.f32.mxu0 %vm3106_vm0, %v3107_v6 }
 0x48a   :  { %1544 = vadd.xlane.f32.xlu0 %v1524_v37  ;;  %2807 = vmatprep.subr.bf16.mxu0 %v3105_v3 }
 0x48d   :  { %2809 = vmatpush3.bf16.msra.mxu0 %v3173_v7 }
 0x48e   :  { %2810 = vmatprep.subr.bf16.mxu0 %v3105_v3 }
 0x491   :  { %2812 = vmatpush3.bf16.msra.mxu0 %v3196_v14 }
 0x492   :  { %2813 = vmatprep.subr.bf16.mxu0 %v3105_v3 }
 0x495   :  { %2815 = vmatpush3.bf16.msra.mxu0 %v3217_v19 }
 0x496   :  { %2816 = vmatprep.subr.bf16.mxu0 %v3105_v3 }
 0x499   :  { %2818 = vmatpush3.bf16.msra.mxu0 %v3237_v24 }
 0x49a   :  { %2819 = vmatprep.subr.bf16.mxu0 %v3105_v3 }
 0x49d   :  { %2821 = vmatpush3.bf16.msra.mxu0 %v3254_v28 }
 0x49e   :  { %2822 = vmatprep.subr.bf16.mxu0 %v3105_v3 }
 0x4a1   :  { %2824 = vmatpush3.bf16.msra.mxu0 %v3267_v31 }
 0x4a2   :  { %2825 = vmatprep.subr.bf16.mxu0 %v3105_v3 }
 0x4a5   :  { %2827 = vmatpush3.bf16.msra.mxu0 %v3279_v34 }
 0x4a6   :  { %2852 = vmatprep.subr.bf16.mxu0 %v3105_v3 }
 0x55b   :  { %v730_v39 = vpop.f32.mrb[20].mxu0 }
 0x55c   :  { %v734_v40 = vadd.f32 %v730_v39, %v218_v38  ;;  %v2285_v41 = vpop.f32.mrb[21].mxu0  ;;  %v268_v38 = vadd.f32 %v3397_v2, %v3348_v46 }
 0x55e   :  { %3035 = vtanh.f32 %v734_v40 }
 0x568   :  { %v3036_v42 = vpop.eup %3035 }
 0x569   :  { %2319 = vmatmul.mubr.f32.vlgmr.msra.gmra.mrb[6].mxu1 %v3036_v42  ;;  %v1525_v43 = vmul.f32 %v3036_v42, %v3354_v51 }
 0x56a   :  { %2830 = vmatpush3.bf16.msra.mxu1 %v3165_v4  ;;  %2388 = vmatprep.mubr.msk.f32.mxu1 %vm3106_vm0, %v3107_v6 }
 0x56b   :  { %1546 = vadd.xlane.f32.xlu1 %v1525_v43  ;;  %2831 = vmatprep.subr.bf16.mxu1 %v3105_v3 }
 0x56e   :  { %2833 = vmatpush3.bf16.msra.mxu1 %v3173_v7 }
 0x56f   :  { %2834 = vmatprep.subr.bf16.mxu1 %v3105_v3 }
 0x572   :  { %2836 = vmatpush3.bf16.msra.mxu1 %v3196_v14 }
 0x573   :  { %2837 = vmatprep.subr.bf16.mxu1 %v3105_v3 }
 0x576   :  { %2839 = vmatpush3.bf16.msra.mxu1 %v3217_v19 }
 0x577   :  { %2840 = vmatprep.subr.bf16.mxu1 %v3105_v3 }
 0x57a   :  { %2842 = vmatpush3.bf16.msra.mxu1 %v3237_v24 }
 0x57b   :  { %2843 = vmatprep.subr.bf16.mxu1 %v3105_v3 }
 0x57e   :  { %2845 = vmatpush3.bf16.msra.mxu1 %v3254_v28 }
 0x57f   :  { %2846 = vmatprep.subr.bf16.mxu1 %v3105_v3 }
 0x582   :  { %2848 = vmatpush3.bf16.msra.mxu1 %v3267_v31 }
 0x583   :  { %2849 = vmatprep.subr.bf16.mxu1 %v3105_v3 }
 0x586   :  { %2851 = vmatpush3.bf16.msra.mxu1 %v3279_v34 }
 0x587   :  { %2876 = vmatprep.subr.bf16.mxu1 %v3105_v3 }
 0x63c   :  { %v805_v45 = vpop.f32.mrb[6].mxu1 }
 0x63d   :  { %v809_v47 = vadd.f32 %v805_v45, %v223_v44  ;;  %v2320_v48 = vpop.f32.mrb[7].mxu1 }
 0x63f   :  { %3037 = vtanh.f32 %v809_v47 }
 0x649   :  { %v3038_v49 = vpop.eup %3037 }
 0x64a   :  { %2354 = vmatmul.mubr.f32.vlgmr.msra.gmra.mrb[22].mxu0 %v3038_v49  ;;  %v1526_v50 = vmul.f32 %v3038_v49, %v3354_v51 }
 0x64b   :  { %2854 = vmatpush3.bf16.msra.mxu0 %v3165_v4  ;;  %2423 = vmatprep.mubr.msk.f32.mxu0 %vm3106_vm0, %v3107_v6 }
 0x64c   :  { %1548 = vadd.xlane.f32.xlu0 %v1526_v50  ;;  %2855 = vmatprep.subr.bf16.mxu0 %v3105_v3 }
 0x64f   :  { %2857 = vmatpush3.bf16.msra.mxu0 %v3173_v7 }
 0x650   :  { %2858 = vmatprep.subr.bf16.mxu0 %v3105_v3 }
 0x653   :  { %2860 = vmatpush3.bf16.msra.mxu0 %v3196_v14 }
 0x654   :  { %2861 = vmatprep.subr.bf16.mxu0 %v3105_v3 }
 0x657   :  { %2863 = vmatpush3.bf16.msra.mxu0 %v3217_v19 }
 0x658   :  { %2864 = vmatprep.subr.bf16.mxu0 %v3105_v3 }
 0x65b   :  { %2866 = vmatpush3.bf16.msra.mxu0 %v3237_v24 }
 0x65c   :  { %2867 = vmatprep.subr.bf16.mxu0 %v3105_v3 }
 0x65f   :  { %2869 = vmatpush3.bf16.msra.mxu0 %v3254_v28 }
 0x660   :  { %2870 = vmatprep.subr.bf16.mxu0 %v3105_v3 }
 0x663   :  { %2872 = vmatpush3.bf16.msra.mxu0 %v3267_v31 }
 0x664   :  { %2873 = vmatprep.subr.bf16.mxu0 %v3105_v3 }
 0x667   :  { %2875 = vmatpush3.bf16.msra.mxu0 %v3279_v34 }
 0x668   :  { %2900 = vmatprep.subr.bf16.mxu0 %v3105_v3 }
 0x71d   :  { %v880_v53 = vpop.f32.mrb[22].mxu0 }
 0x71e   :  { %v884_v54 = vadd.f32 %v880_v53, %v228_v52  ;;  %v2355_v55 = vpop.f32.mrb[23].mxu0 }
 0x720   :  { %3039 = vtanh.f32 %v884_v54 }
 0x72a   :  { %v3040_v56 = vpop.eup %3039 }
 0x72b   :  { %1496 = vst [vmem:[#allocation6] sm:$0xff] %v3040_v56  ;;  %2389 = vmatmul.mubr.f32.vlgmr.msra.gmra.mrb[8].mxu1 %v3040_v56  ;;  %v1527_v57 = vmul.f32 %v3040_v56, %v3354_v51 }
 0x72c   :  { %2878 = vmatpush3.bf16.msra.mxu1 %v3165_v4  ;;  %2458 = vmatprep.mubr.msk.f32.mxu1 %vm3106_vm0, %v3107_v6 }
 0x72d   :  { %1550 = vadd.xlane.f32.xlu1 %v1527_v57  ;;  %2879 = vmatprep.subr.bf16.mxu1 %v3105_v3 }
 0x730   :  { %2881 = vmatpush3.bf16.msra.mxu1 %v3173_v7 }
 0x731   :  { %2882 = vmatprep.subr.bf16.mxu1 %v3105_v3 }
 0x734   :  { %2884 = vmatpush3.bf16.msra.mxu1 %v3196_v14 }
 0x735   :  { %2885 = vmatprep.subr.bf16.mxu1 %v3105_v3 }
 0x738   :  { %2887 = vmatpush3.bf16.msra.mxu1 %v3217_v19 }
 0x739   :  { %2888 = vmatprep.subr.bf16.mxu1 %v3105_v3 }
 0x73c   :  { %2890 = vmatpush3.bf16.msra.mxu1 %v3237_v24 }
 0x73d   :  { %2891 = vmatprep.subr.bf16.mxu1 %v3105_v3 }
 0x740   :  { %2893 = vmatpush3.bf16.msra.mxu1 %v3254_v28 }
 0x741   :  { %2894 = vmatprep.subr.bf16.mxu1 %v3105_v3 }
 0x744   :  { %2896 = vmatpush3.bf16.msra.mxu1 %v3267_v31 }
 0x745   :  { %2897 = vmatprep.subr.bf16.mxu1 %v3105_v3 }
 0x748   :  { %2899 = vmatpush3.bf16.msra.mxu1 %v3279_v34 }
 0x749   :  { %2924 = vmatprep.subr.bf16.mxu1 %v3105_v3 }
 0x7fe   :  { %v955_v59 = vpop.f32.mrb[8].mxu1 }
 0x7ff   :  { %v959_v8 = vadd.f32 %v955_v59, %v233_v58  ;;  %v2390_v9 = vpop.f32.mrb[9].mxu1 }
 0x801   :  { %3041 = vtanh.f32 %v959_v8 }
 0x80b   :  { %v3042_v10 = vpop.eup %3041 }
 0x80c   :  { %2424 = vmatmul.mubr.f32.vlgmr.msra.gmra.mrb[24].mxu0 %v3042_v10  ;;  %v1528_v11 = vmul.f32 %v3042_v10, %v3354_v51 }
 0x80d   :  { %2902 = vmatpush3.bf16.msra.mxu0 %v3165_v4  ;;  %2493 = vmatprep.mubr.msk.f32.mxu0 %vm3106_vm0, %v3107_v6 }
 0x80e   :  { %1552 = vadd.xlane.f32.xlu0 %v1528_v11  ;;  %2903 = vmatprep.subr.bf16.mxu0 %v3105_v3 }
 0x811   :  { %2905 = vmatpush3.bf16.msra.mxu0 %v3173_v7 }
 0x812   :  { %2906 = vmatprep.subr.bf16.mxu0 %v3105_v3 }
 0x815   :  { %2908 = vmatpush3.bf16.msra.mxu0 %v3196_v14 }
 0x816   :  { %2909 = vmatprep.subr.bf16.mxu0 %v3105_v3 }
 0x819   :  { %2911 = vmatpush3.bf16.msra.mxu0 %v3217_v19 }
 0x81a   :  { %2912 = vmatprep.subr.bf16.mxu0 %v3105_v3 }
 0x81d   :  { %2914 = vmatpush3.bf16.msra.mxu0 %v3237_v24 }
 0x81e   :  { %2915 = vmatprep.subr.bf16.mxu0 %v3105_v3 }
 0x821   :  { %2917 = vmatpush3.bf16.msra.mxu0 %v3254_v28 }
 0x822   :  { %2918 = vmatprep.subr.bf16.mxu0 %v3105_v3 }
 0x825   :  { %2920 = vmatpush3.bf16.msra.mxu0 %v3267_v31 }
 0x826   :  { %2921 = vmatprep.subr.bf16.mxu0 %v3105_v3 }
 0x829   :  { %2923 = vmatpush3.bf16.msra.mxu0 %v3279_v34 }
 0x82a   :  { %2948 = vmatprep.subr.bf16.mxu0 %v3105_v3 }
 0x8df   :  { %v1030_v12 = vpop.f32.mrb[24].mxu0 }
 0x8e0   :  { %v1034_v13 = vadd.f32 %v1030_v12, %v238_v61  ;;  %v2425_v15 = vpop.f32.mrb[25].mxu0 }
 0x8e2   :  { %3043 = vtanh.f32 %v1034_v13 }
 0x8ec   :  { %v3044_v16 = vpop.eup %3043 }
 0x8ed   :  { %2459 = vmatmul.mubr.f32.vlgmr.msra.gmra.mrb[10].mxu1 %v3044_v16  ;;  %v1529_v17 = vmul.f32 %v3044_v16, %v3354_v51 }
 0x8ee   :  { %2926 = vmatpush3.bf16.msra.mxu1 %v3165_v4  ;;  %2528 = vmatprep.mubr.msk.f32.mxu1 %vm3106_vm0, %v3107_v6 }
 0x8ef   :  { %1554 = vadd.xlane.f32.xlu1 %v1529_v17  ;;  %2927 = vmatprep.subr.bf16.mxu1 %v3105_v3 }
 0x8f2   :  { %2929 = vmatpush3.bf16.msra.mxu1 %v3173_v7 }
 0x8f3   :  { %2930 = vmatprep.subr.bf16.mxu1 %v3105_v3 }
 0x8f6   :  { %2932 = vmatpush3.bf16.msra.mxu1 %v3196_v14 }
 0x8f7   :  { %2933 = vmatprep.subr.bf16.mxu1 %v3105_v3 }
 0x8fa   :  { %2935 = vmatpush3.bf16.msra.mxu1 %v3217_v19 }
 0x8fb   :  { %2936 = vmatprep.subr.bf16.mxu1 %v3105_v3 }
 0x8fe   :  { %2938 = vmatpush3.bf16.msra.mxu1 %v3237_v24 }
 0x8ff   :  { %2939 = vmatprep.subr.bf16.mxu1 %v3105_v3 }
 0x902   :  { %2941 = vmatpush3.bf16.msra.mxu1 %v3254_v28 }
 0x903   :  { %2942 = vmatprep.subr.bf16.mxu1 %v3105_v3 }
 0x906   :  { %2944 = vmatpush3.bf16.msra.mxu1 %v3267_v31 }
 0x907   :  { %2945 = vmatprep.subr.bf16.mxu1 %v3105_v3 }
 0x90a   :  { %2947 = vmatpush3.bf16.msra.mxu1 %v3279_v34 }
 0x90b   :  { %2972 = vmatprep.subr.bf16.mxu1 %v3105_v3 }
 0x9c0   :  { %v1105_v18 = vpop.f32.mrb[10].mxu1 }
 0x9c1   :  { %v1109_v20 = vadd.f32 %v1105_v18, %v243_v60  ;;  %v2460_v21 = vpop.f32.mrb[11].mxu1 }
 0x9c3   :  { %3045 = vtanh.f32 %v1109_v20 }
 0x9cd   :  { %v3046_v22 = vpop.eup %3045 }
 0x9ce   :  { %2494 = vmatmul.mubr.f32.vlgmr.msra.gmra.mrb[26].mxu0 %v3046_v22  ;;  %v1530_v23 = vmul.f32 %v3046_v22, %v3354_v51 }
 0x9cf   :  { %2950 = vmatpush3.bf16.msra.mxu0 %v3165_v4  ;;  %2563 = vmatprep.mubr.msk.f32.mxu0 %vm3106_vm0, %v3107_v6 }
 0x9d0   :  { %1556 = vadd.xlane.f32.xlu0 %v1530_v23  ;;  %2951 = vmatprep.subr.bf16.mxu0 %v3105_v3 }
 0x9d3   :  { %2953 = vmatpush3.bf16.msra.mxu0 %v3173_v7 }
 0x9d4   :  { %2954 = vmatprep.subr.bf16.mxu0 %v3105_v3 }
 0x9d7   :  { %2956 = vmatpush3.bf16.msra.mxu0 %v3196_v14 }
 0x9d8   :  { %2957 = vmatprep.subr.bf16.mxu0 %v3105_v3 }
 0x9db   :  { %2959 = vmatpush3.bf16.msra.mxu0 %v3217_v19 }
 0x9dc   :  { %2960 = vmatprep.subr.bf16.mxu0 %v3105_v3 }
 0x9df   :  { %2962 = vmatpush3.bf16.msra.mxu0 %v3237_v24 }
 0x9e0   :  { %2963 = vmatprep.subr.bf16.mxu0 %v3105_v3 }
 0x9e3   :  { %2965 = vmatpush3.bf16.msra.mxu0 %v3254_v28 }
 0x9e4   :  { %2966 = vmatprep.subr.bf16.mxu0 %v3105_v3 }
 0x9e7   :  { %2968 = vmatpush3.bf16.msra.mxu0 %v3267_v31 }
 0x9e8   :  { %2969 = vmatprep.subr.bf16.mxu0 %v3105_v3 }
 0x9eb   :  { %2971 = vmatpush3.bf16.msra.mxu0 %v3279_v34 }
 0x9ec   :  { %2996 = vmatprep.subr.bf16.mxu0 %v3105_v3 }
 0xaa1   :  { %v1180_v25 = vpop.f32.mrb[26].mxu0 }
 0xaa2   :  { %v1184_v26 = vadd.f32 %v1180_v25, %v248_v63  ;;  %v2495_v27 = vpop.f32.mrb[27].mxu0 }
 0xaa4   :  { %3047 = vtanh.f32 %v1184_v26 }
 0xaae   :  { %v3048_v29 = vpop.eup %3047 }
 0xaaf   :  { %2529 = vmatmul.mubr.f32.vlgmr.msra.gmra.mrb[12].mxu1 %v3048_v29  ;;  %v1531_v30 = vmul.f32 %v3048_v29, %v3354_v51 }
 0xab0   :  { %2974 = vmatpush3.bf16.msra.mxu1 %v3165_v4  ;;  %2598 = vmatprep.mubr.msk.f32.mxu1 %vm3106_vm0, %v3107_v6 }
 0xab1   :  { %1558 = vadd.xlane.f32.xlu1 %v1531_v30  ;;  %2975 = vmatprep.subr.bf16.mxu1 %v3105_v3 }
 0xab4   :  { %2977 = vmatpush3.bf16.msra.mxu1 %v3173_v7 }
 0xab5   :  { %2978 = vmatprep.subr.bf16.mxu1 %v3105_v3 }
 0xab8   :  { %2980 = vmatpush3.bf16.msra.mxu1 %v3196_v14 }
 0xab9   :  { %2981 = vmatprep.subr.bf16.mxu1 %v3105_v3 }
 0xabc   :  { %2983 = vmatpush3.bf16.msra.mxu1 %v3217_v19 }
 0xabd   :  { %2984 = vmatprep.subr.bf16.mxu1 %v3105_v3 }
 0xac0   :  { %2986 = vmatpush3.bf16.msra.mxu1 %v3237_v24 }
 0xac1   :  { %2987 = vmatprep.subr.bf16.mxu1 %v3105_v3 }
 0xac4   :  { %2989 = vmatpush3.bf16.msra.mxu1 %v3254_v28 }
 0xac5   :  { %2990 = vmatprep.subr.bf16.mxu1 %v3105_v3 }
 0xac8   :  { %2992 = vmatpush3.bf16.msra.mxu1 %v3267_v31 }
 0xac9   :  { %2993 = vmatprep.subr.bf16.mxu1 %v3105_v3 }
 0xacc   :  { %2995 = vmatpush3.bf16.msra.mxu1 %v3279_v34 }
 0xb82   :  { %v1255_v32 = vpop.f32.mrb[12].mxu1 }
 0xb83   :  { %v1259_v33 = vadd.f32 %v1255_v32, %v253_v62  ;;  %v2530_v35 = vpop.f32.mrb[13].mxu1 }
 0xb85   :  { %3049 = vtanh.f32 %v1259_v33 }
 0xb8f   :  { %v3050_v36 = vpop.eup %3049 }
 0xb90   :  { %2564 = vmatmul.mubr.f32.vlgmr.msra.gmra.mrb[28].mxu0 %v3050_v36  ;;  %v1532_v37 = vmul.f32 %v3050_v36, %v3354_v51 }
 0xb91   :  { %2998 = vmatpush3.bf16.msra.mxu0 %v3165_v4  ;;  %2633 = vmatprep.mubr.msk.f32.mxu0 %vm3106_vm0, %v3107_v6  ;;  %v258_v4 = vadd.f32 %v3393_v0, %v3348_v46 }
 0xb92   :  { %1560 = vadd.xlane.f32.xlu0 %v1532_v37  ;;  %2999 = vmatprep.subr.bf16.mxu0 %v3105_v3 }
 0xb95   :  { %3001 = vmatpush3.bf16.msra.mxu0 %v3173_v7 }
 0xb96   :  { %3002 = vmatprep.subr.bf16.mxu0 %v3105_v3 }
 0xb99   :  { %3004 = vmatpush3.bf16.msra.mxu0 %v3196_v14 }
 0xb9a   :  { %3005 = vmatprep.subr.bf16.mxu0 %v3105_v3 }
 0xb9d   :  { %3007 = vmatpush3.bf16.msra.mxu0 %v3217_v19 }
 0xb9e   :  { %3008 = vmatprep.subr.bf16.mxu0 %v3105_v3 }
 0xba1   :  { %3010 = vmatpush3.bf16.msra.mxu0 %v3237_v24 }
 0xba2   :  { %3011 = vmatprep.subr.bf16.mxu0 %v3105_v3 }
 0xba5   :  { %3013 = vmatpush3.bf16.msra.mxu0 %v3254_v28  ;;  %v263_v28 = vadd.f32 %v3348_v46, %v3399_v5 }
 0xba6   :  { %3014 = vmatprep.subr.bf16.mxu0 %v3105_v3 }
 0xba9   :  { %3016 = vmatpush3.bf16.msra.mxu0 %v3267_v31 }
 0xbaa   :  { %3017 = vmatprep.subr.bf16.mxu0 %v3105_v3 }
 0xbad   :  { %3019 = vmatpush3.bf16.msra.mxu0 %v3279_v34 }
 0xc63   :  { %v1330_v6 = vpop.f32.mrb[28].mxu0 }
 0xc64   :  { %v1334_v7 = vadd.f32 %v1330_v6, %v258_v4  ;;  %v2565_v14 = vpop.f32.mrb[29].mxu0 }
 0xc66   :  { %3051 = vtanh.f32 %v1334_v7 }
 0xc70   :  { %v3052_v19 = vpop.eup %3051 }
 0xc71   :  { %2599 = vmatmul.mubr.f32.vlgmr.msra.gmra.mrb[14].mxu1 %v3052_v19  ;;  %v1533_v24 = vmul.f32 %v3052_v19, %v3354_v51 }
 0xc73   :  { %1562 = vadd.xlane.f32.xlu1 %v1533_v24 }
 0xd44   :  { %v1405_v31 = vpop.f32.mrb[14].mxu1 }
 0xd45   :  { %v1409_v1 = vadd.f32 %v1405_v31, %v263_v28  ;;  %v2600_v3 = vpop.f32.mrb[15].mxu1 }
 0xd47   :  { %3053 = vtanh.f32 %v1409_v1 }
 0xd51   :  { %v3054_v34 = vpop.eup %3053 }
 0xd52   :  { %2634 = vmatmul.mubr.f32.vlgmr.msra.gmra.mrb[30].mxu0 %v3054_v34  ;;  %v1534_v0 = vmul.f32 %v3054_v34, %v3354_v51 }
 0xd54   :  { %1564 = vadd.xlane.f32.xlu0 %v1534_v0 }
 0xe25   :  { %v1480_v39 = vpop.f32.mrb[30].mxu0 }
 0xe26   :  { %v1484_v40 = vadd.f32 %v1480_v39, %v268_v38  ;;  %v2635_v41 = vpop.f32.mrb[31].mxu0 }
 0xe28   :  { %3055 = vtanh.f32 %v1484_v40 }
 0xe32   :  { %v3056_v42 = vpop.eup %3055 }
 0xe33   :  { %v1535_v43 = vmul.f32 %v3056_v42, %v3354_v51 }
 0xe35   :  { %1566 = vadd.xlane.f32.xlu1 %v1535_v43 }
 0xe36   :  { %3068 = shalt.err (!%p3065_p4)
}
 0xe37   :  { %s3069_s30 = scalar_lea.hbm %s3748_s8, 128 }
 0xe38   :  { %p3070_p5 = scmp.ne.s32.totalorder %s3748_s8, %s3069_s30  ;;  %p3073_p6 = scmp.lt.u32.totalorder %s3069_s30, %s3748_s8 }
 0xe3a   :  { %p3075_p7 = pnand %p3073_p6, %p3070_p5 }
 0xe3c   :  { %3078 = shalt.err (!%p3075_p7)
}
 0xe3d   :  { %1734 = dma.vmem_to_hbm [thread:$0]  %s1732_s5, 128, %s3748_s8, [#allocation7]   ;;  %v1537_v46 = vpop.xlane.xlu0 %1536  ;;  %v1602_v51 = vlaneseq  ;;  %v1541_v2 = vpop.xlane.xlu1 %1540  ;;  %v3679_v52 = vstv %s3746_s6  ;;  %vm1613_vm2 = vcmask 130112   ;;  %vm1620_vm3 = vcmask 195712  }
 0xe3e   :  { %v1570_v8 = vadd.f32 %v3679_v52, %v1537_v46  ;;  %v1572_v10 = vadd.f32 %v3679_v52, %v1541_v2  ;;  %vm1627_vm4 = vcmask 261312   ;;  %vm1634_vm5 = vcmask 326912   ;;  %s3109_s6 = smov [#allocation4]  }
 0xe3f   :  { %v3670_v44 = vand.u32 127, %v1602_v51  ;;  %v3673_v49 = vshrl.u32 %v1602_v51, 7  ;;  %vm1641_vm6 = vcmask 392512   ;;  %vm1648_vm7 = vcmask 458112   ;;  %s1721_s8 = sshll.u32 %s3109_s6, 4  ;;  %s1722_s8 = int_to_ptr.vmem [resolvable:$true] %s1721_s8 }
 0xe40   :  { %vm1655_vm8 = vcmask 523712   ;;  %vm1662_vm9 = vcmask 589312   ;;  %vm1669_vm10 = vcmask 654912   ;;  %vm1676_vm11 = vcmask 720512   ;;  %s3079_s15 = scalar_lea.vmem %s1722_s8, 16  ;;  %s3083_s16 = scalar_lea.vmem %s1722_s8, 32 }
 0xe41   :  { %v1539_v5 = vpop.xlane.xlu0 %1538  ;;  %v1608_v45 = vadd.s32 4294967288, %v3670_v44  ;;  %v1543_v47 = vpop.xlane.xlu1 %1542  ;;  %v1615_v50 = vadd.s32 4294967280, %v3670_v44  ;;  %v1622_v53 = vadd.s32 4294967272, %v3670_v44  ;;  %v1629_v56 = vadd.s32 4294967264, %v3670_v44  ;;  %p3080_p8 = scmp.ne.s32.totalorder %s1722_s8, %s3079_s15  ;;  %p3084_p9 = scmp.lt.s32.totalorder %s1722_s8, %s1722_s8 }
 0xe42   :  { %v1571_v55 = vadd.f32 %v3679_v52, %v1539_v5  ;;  %v1606_v59 = vsub.s32 %v3670_v44, %v3673_v49  ;;  %v1573_v61 = vadd.f32 %v3679_v52, %v1543_v47  ;;  %v1636_v12 = vadd.s32 4294967256, %v3670_v44  ;;  %p3085_p10 = scmp.lt.s32.totalorder %s3083_s16, %s3079_s15 }
 0xe43   :  { %v1611_v54 = vsub.s32 %v1608_v45, %v3673_v49  ;;  %v1618_v9 = vsub.s32 %v1615_v50, %v3673_v49  ;;  %v1625_v11 = vsub.s32 %v1622_v53, %v3673_v49  ;;  %v1632_v15 = vsub.s32 %v1629_v56, %v3673_v49 }
 0xe44   :  { %v1643_v60 = vadd.s32 4294967248, %v3670_v44  ;;  %v1607_v20 = vrot.slane %v1570_v8, %v1606_v59  ;;  %v1639_v23 = vsub.s32 %v1636_v12, %v3673_v49  ;;  %v1650_v62 = vadd.s32 4294967240, %v3670_v44  ;;  %p3086_p11 = por %p3085_p10, %p3084_p9 }
 0xe45   :  { %v1545_v48 = vpop.xlane.xlu0 %1544  ;;  %v1547_v57 = vpop.xlane.xlu1 %1546  ;;  %v1612_v13 = vrot.slane %v1571_v55, %v1611_v54  ;;  %v1619_v21 = vrot.slane %v1572_v10, %v1618_v9  ;;  %v1626_v22 = vrot.slane %v1573_v61, %v1625_v11  ;;  %v1657_v35 = vadd.s32 4294967232, %v3670_v44 }
 0xe46   :  { %v1574_v16 = vadd.f32 %v3679_v52, %v1545_v48  ;;  %v1575_v63 = vadd.f32 %v3679_v52, %v1547_v57  ;;  %v1646_v29 = vsub.s32 %v1643_v60, %v3673_v49  ;;  %v1664_v4 = vadd.s32 4294967224, %v3670_v44  ;;  %p3087_p12 = pnand %p3086_p11, %p3080_p8 }
 0xe47   :  { %v1614_v25 = vsel %vm1613_vm2, %v1612_v13, %v1607_v20  ;;  %v1671_v7 = vadd.s32 4294967216, %v3670_v44  ;;  %v1653_v24 = vsub.s32 %v1650_v62, %v3673_v49  ;;  %v1678_v31 = vadd.s32 4294967208, %v3670_v44 }
 0xe48   :  { %v1633_v26 = vrot.slane %v1574_v16, %v1632_v15  ;;  %v1621_v33 = vsel %vm1620_vm3, %v1619_v21, %v1614_v25  ;;  %v1640_v37 = vrot.slane %v1575_v63, %v1639_v23  ;;  %v1660_v3 = vsub.s32 %v1657_v35, %v3673_v49 }
 0xe49   :  { %v1549_v58 = vpop.xlane.xlu0 %1548  ;;  %v1551_v17 = vpop.xlane.xlu1 %1550  ;;  %v1628_v36 = vsel %vm1627_vm4, %v1626_v22, %v1621_v33  ;;  %v1685_v0 = vadd.s32 4294967200, %v3670_v44  ;;  %v1667_v39 = vsub.s32 %v1664_v4, %v3673_v49  ;;  %v1692_v41 = vadd.s32 4294967192, %v3670_v44 }
 0xe4a   :  { %v1576_v30 = vadd.f32 %v3679_v52, %v1549_v58  ;;  %v1635_v6 = vsel %vm1634_vm5, %v1633_v26, %v1628_v36  ;;  %v1577_v28 = vadd.f32 %v3679_v52, %v1551_v17  ;;  %v1674_v42 = vsub.s32 %v1671_v7, %v3673_v49 }
 0xe4b   :  { %v1642_v38 = vsel %vm1641_vm6, %v1640_v37, %v1635_v6  ;;  %v1699_v51 = vadd.s32 4294967184, %v3670_v44  ;;  %v1681_v45 = vsub.s32 %v1678_v31, %v3673_v49  ;;  %v1688_v53 = vsub.s32 %v1685_v0, %v3673_v49 }
 0xe4c   :  { %v1647_v19 = vrot.slane %v1576_v30, %v1646_v29  ;;  %v1654_v5 = vrot.slane %v1577_v28, %v1653_v24  ;;  %v1695_v56 = vsub.s32 %v1692_v41, %v3673_v49  ;;  %v1706_v58 = vadd.s32 4294967176, %v3670_v44 }
 0xe4d   :  { %v1553_v18 = vpop.xlane.xlu0 %1552  ;;  %v1555_v27 = vpop.xlane.xlu1 %1554  ;;  %v1702_v8 = vsub.s32 %v1699_v51, %v3673_v49  ;;  %vm1683_vm12 = vcmask 786112   ;;  %vm1690_vm13 = vcmask 851712   ;;  %vm1697_vm14 = vcmask 917312  }
 0xe4e   :  { %v1578_v34 = vadd.f32 %v3679_v52, %v1553_v18  ;;  %v1579_v40 = vadd.f32 %v3679_v52, %v1555_v27  ;;  %v1649_v2 = vsel %vm1648_vm7, %v1647_v19, %v1642_v38  ;;  %v1709_v16 = vsub.s32 %v1706_v58, %v3673_v49 }
 0xe4f   :  { %v1656_v10 = vsel %vm1655_vm8, %v1654_v5, %v1649_v2  ;;  %vm1704_vm15 = vcmask 982912   ;;  %vm1711_vm0 = vcmask 1048512  }
 0xe50   :  { %v1661_v50 = vrot.slane %v1578_v34, %v1660_v3  ;;  %v1668_v55 = vrot.slane %v1579_v40, %v1667_v39 }
 0xe51   :  { %v1557_v32 = vpop.xlane.xlu0 %1556  ;;  %v1559_v14 = vpop.xlane.xlu1 %1558 }
 0xe52   :  { %v1580_v43 = vadd.f32 %v3679_v52, %v1557_v32  ;;  %v1581_v47 = vadd.f32 %v3679_v52, %v1559_v14  ;;  %v1663_v61 = vsel %vm1662_vm9, %v1661_v50, %v1656_v10 }
 0xe53   :  { %v1670_v13 = vsel %vm1669_vm10, %v1668_v55, %v1663_v61 }
 0xe54   :  { %v1675_v59 = vrot.slane %v1580_v43, %v1674_v42  ;;  %v1682_v11 = vrot.slane %v1581_v47, %v1681_v45 }
 0xe55   :  { %v1561_v1 = vpop.xlane.xlu0 %1560  ;;  %v1563_v46 = vpop.xlane.xlu1 %1562 }
 0xe56   :  { %v1582_v54 = vadd.f32 %v3679_v52, %v1561_v1  ;;  %v1583_v57 = vadd.f32 %v3679_v52, %v1563_v46  ;;  %v1677_v17 = vsel %vm1676_vm11, %v1675_v59, %v1670_v13 }
 0xe57   :  { %v1684_v18 = vsel %vm1683_vm12, %v1682_v11, %v1677_v17 }
 0xe58   :  { %v1689_v12 = vrot.slane %v1582_v54, %v1688_v53  ;;  %v1696_v15 = vrot.slane %v1583_v57, %v1695_v56 }
 0xe59   :  { %v1565_v48 = vpop.xlane.xlu0 %1564 }
 0xe5a   :  { %v1584_v9 = vadd.f32 %v3679_v52, %v1565_v48  ;;  %v1691_v21 = vsel %vm1690_vm13, %v1689_v12, %v1684_v18 }
 0xe5b   :  { %v1698_v23 = vsel %vm1697_vm14, %v1696_v15, %v1691_v21 }
 0xe5c   :  { %v1703_v44 = vrot.slane %v1584_v9, %v1702_v8 }
 0xe5e   :  { %v1705_v63 = vsel %vm1704_vm15, %v1703_v44, %v1698_v23 }
 0xec2   :  { %v1567_v60 = vpop.xlane.xlu1 %1566 }
 0xec3   :  { %v1585_v20 = vadd.f32 %v3679_v52, %v1567_v60 }
 0xec5   :  { %v1710_v22 = vrot.slane %v1585_v20, %v1709_v16 }
 0xec7   :  { %v1712_v25 = vsel %vm1711_vm0, %v1710_v22, %v1705_v63 }
 0xec8   :  { %1714 = vst [vmem:[#allocation4] sm:$0x1] %v1712_v25 }
 0xec9   :  { %3090 = shalt.err (!%p3087_p12)
}
 0xeca   :  { %s3091_s19 = scalar_lea.hbm %s3747_s7, 16 }
 0xecb   :  { %p3092_p13 = scmp.ne.s32.totalorder %s3747_s7, %s3091_s19  ;;  %p3095_p0 = scmp.lt.u32.totalorder %s3091_s19, %s3747_s7 }
 0xecd   :  { %p3097_p1 = pnand %p3095_p0, %p3092_p13 }
 0xecf   :  { %3100 = shalt.err (!%p3097_p1)
}
 0xed0   :  { %1724 = dma.vmem_to_hbm [thread:$0]  %s1722_s8, 16, %s3747_s7, [#allocation5]  }
 0xed1   :  { %3101 = dma.done.wait [#allocation5], 16  }
 0xed2   :  { %3102 = vsyncadd [#allocation5], 4294967280 }
 0xed3   :  { %3103 = dma.done.wait [#allocation7], 128  }
 0xed4   :  { %3104 = vsyncadd [#allocation7], 4294967168 }
 0xed5   :  { %1741 = vsyncpa [#allocation5], 1 }
 0xed6   :  { %1742 = vsyncpa [#allocation7], 1 }

</bundles_post_ra>
